<compile_context>
chip_gen: v7x
topology: tpu7x:2x2x1
jax: 0.10.0
libtpu: 0.0.40
codegen_flags: <defaults>
</compile_context>

<pallas_src>
import math
from functools import partial

import jax
import jax.numpy as jnp
from jax import lax
from jax.experimental import pallas as pl
from jax.experimental.pallas import tpu as pltpu


# ----------------------------------------------------------------------------
# helpers
# ----------------------------------------------------------------------------
def _seq_tile(S):
    """Pick a query-sequence tile: multiple of 8, divides S, <= 512."""
    for t in (512, 256, 128, 64, 32, 16, 8):
        if t <= S and S % t == 0:
            return t
    return S


def _vmem_limit(nbytes):
    # keep within physical VMEM on all targets (v7x has 64 MiB per TensorCore)
    return int(min(max(nbytes, 16 * 1024 * 1024), 64 * 1024 * 1024))


# ----------------------------------------------------------------------------
# kernel 1: per-(batch, q-tile, head) attention, accumulated over heads,
#           residual add + LayerNorm fused into the last-head epilogue
# ----------------------------------------------------------------------------
def _mha_add_ln_kernel(scale, eps, has_mask, *refs):
    if has_mask:
        (x_ref, kv_ref, mask_ref,
         wq_ref, bq_ref, wk_ref, bk_ref, wv_ref, bv_ref,
         wo_ref, bo_ref, g_ref, be_ref, o_ref, acc_ref) = refs
    else:
        (x_ref, kv_ref,
         wq_ref, bq_ref, wk_ref, bk_ref, wv_ref, bv_ref,
         wo_ref, bo_ref, g_ref, be_ref, o_ref, acc_ref) = refs

    h = pl.program_id(2)
    nh = pl.num_programs(2)

    @pl.when(h == 0)
    def _():
        acc_ref[...] = jnp.zeros_like(acc_ref)

    x = x_ref[0]                       # (ts, D) f32
    kv = kv_ref[0]                     # (T, D)  f32
    xb = x.astype(jnp.bfloat16)
    kvb = kv.astype(jnp.bfloat16)

    # Per-head projections: plain 2-D MXU matmuls, bf16 operands, f32 accumulate.
    q = jnp.dot(xb, wq_ref[0], preferred_element_type=jnp.float32) + bq_ref[0]   # (ts, dh)
    k = jnp.dot(kvb, wk_ref[0], preferred_element_type=jnp.float32) + bk_ref[0]  # (T, dh)
    v = jnp.dot(kvb, wv_ref[0], preferred_element_type=jnp.float32) + bv_ref[0]  # (T, dh)

    # Fold 1/sqrt(dh) into q once (cheaper than scaling ts*T scores).
    qb = (q * scale).astype(jnp.bfloat16)
    kb = k.astype(jnp.bfloat16)

    # scores: contract dh of both operands -> no explicit transpose needed.
    s = lax.dot_general(qb, kb, (((1,), (1,)), ((), ())),
                        preferred_element_type=jnp.float32)       # (ts, T) f32
    if has_mask:
        s = s + mask_ref[...]

    # Numerically stable softmax; normalization via EUP approx reciprocal.
    m = jnp.max(s, axis=-1, keepdims=True)
    p = jnp.exp(s - m)
    p = p * pl.reciprocal(jnp.sum(p, axis=-1, keepdims=True), approx=True)

    ctx = jnp.dot(p.astype(jnp.bfloat16), v.astype(jnp.bfloat16),
                  preferred_element_type=jnp.float32)             # (ts, dh)

    # Accumulate this head's contribution to the output projection.
    acc_ref[...] += jnp.dot(ctx.astype(jnp.bfloat16), wo_ref[0],
                            preferred_element_type=jnp.float32)   # (ts, D)

    @pl.when(h == nh - 1)
    def _():
        # Fused epilogue: dropout(identity) + residual add + LayerNorm, all f32.
        y = acc_ref[...] + bo_ref[...] + x.astype(jnp.float32)
        mu = jnp.mean(y, axis=-1, keepdims=True)
        var = jnp.mean(jnp.square(y - mu), axis=-1, keepdims=True)
        y = (y - mu) * lax.rsqrt(var + eps)
        y = y * g_ref[...] + be_ref[...]
        o_ref[0] = y.astype(o_ref.dtype)


# ----------------------------------------------------------------------------
# kernel 2: FFN (Linear -> ReLU -> Linear) + residual add + LayerNorm
# ----------------------------------------------------------------------------
def _ffn_add_ln_kernel(eps, x_ref, w1_ref, b1_ref, w2_ref, b2_ref, g_ref, be_ref, o_ref):
    x = x_ref[0]                                  # (ts, D) f32
    xb = x.astype(jnp.bfloat16)
    h = jnp.dot(xb, w1_ref[...], preferred_element_type=jnp.float32) + b1_ref[...]
    h = jnp.maximum(h, 0.0)
    y = jnp.dot(h.astype(jnp.bfloat16), w2_ref[...],
                preferred_element_type=jnp.float32) + b2_ref[...]
    y = y + x.astype(jnp.float32)
    mu = jnp.mean(y, axis=-1, keepdims=True)
    var = jnp.mean(jnp.square(y - mu), axis=-1, keepdims=True)
    y = (y - mu) * lax.rsqrt(var + eps)
    y = y * g_ref[...] + be_ref[...]
    o_ref[0] = y.astype(o_ref.dtype)


# ----------------------------------------------------------------------------
# Pallas wrappers
# ----------------------------------------------------------------------------
def mha_add_layernorm(x, kv, p, gamma, beta, headnum, mask=None, eps=1e-5):
    """LayerNorm(MHA(x, kv, kv) + x). K/V are full length per query tile."""
    B, S, D = x.shape
    T = kv.shape[1]
    dh = D // headnum
    ts = _seq_tile(S)
    grid = (B, S // ts, headnum)
    has_mask = mask is not None
    wdt = jnp.bfloat16

    # Per-head weight slabs (host-side reshape/transpose; head h uses columns [h*dh:(h+1)*dh]).
    wq = p["wq"].astype(wdt).reshape(D, headnum, dh).transpose(1, 0, 2)   # (H, D, dh)
    wk = p["wk"].astype(wdt).reshape(D, headnum, dh).transpose(1, 0, 2)
    wv = p["wv"].astype(wdt).reshape(D, headnum, dh).transpose(1, 0, 2)
    wo = p["wo"].astype(wdt).reshape(headnum, dh, D)                      # (H, dh, D)
    bq = p["bq"].astype(jnp.float32).reshape(headnum, 1, dh)
    bk = p["bk"].astype(jnp.float32).reshape(headnum, 1, dh)
    bv = p["bv"].astype(jnp.float32).reshape(headnum, 1, dh)
    bo = p["bo"].astype(jnp.float32).reshape(1, D)
    g2 = gamma.astype(jnp.float32).reshape(1, D)
    b2 = beta.astype(jnp.float32).reshape(1, D)

    x_spec = pl.BlockSpec((1, ts, D), lambda b, s, h: (b, s, 0))
    kv_spec = pl.BlockSpec((1, T, D), lambda b, s, h: (b, 0, 0))
    wqkv_spec = pl.BlockSpec((1, D, dh), lambda b, s, h: (h, 0, 0))
    bqkv_spec = pl.BlockSpec((1, 1, dh), lambda b, s, h: (h, 0, 0))
    wo_spec = pl.BlockSpec((1, dh, D), lambda b, s, h: (h, 0, 0))
    vec_spec = pl.BlockSpec((1, D), lambda b, s, h: (0, 0))

    in_specs = [x_spec, kv_spec]
    args = [x, kv]
    if has_mask:
        in_specs.append(pl.BlockSpec((ts, T), lambda b, s, h: (s, 0)))
        args.append(mask.astype(jnp.float32))
    in_specs += [wqkv_spec, bqkv_spec, wqkv_spec, bqkv_spec, wqkv_spec, bqkv_spec,
                 wo_spec, vec_spec, vec_spec, vec_spec]
    args += [wq, bq, wk, bk, wv, bv, wo, bo, g2, b2]

    # rough per-step VMEM need (double-buffered blocks + f32 intermediates), with headroom
    blk = (2 * ts * D * 4 + 2 * T * D * 4
           + (2 * ts * T * 4 if has_mask else 0)
           + 2 * 4 * D * dh * 2
           + 2 * ts * D * 4 + ts * D * 4
           + (ts + 2 * T) * dh * 4 + 3 * ts * T * 4 + 2 * ts * D * 4)
    flops = int(2 * B * (S // ts) * headnum
                * (ts * D * dh + 2 * T * D * dh + 2 * ts * T * dh + ts * dh * D))
    trans = int(B * S * T * headnum)
    bytes_acc = int(2 * B * S * D * 4 + B * T * D * 4
                    + (B * S * T * 4 if has_mask else 0)
                    + B * (S // ts) * 4 * D * D * 2)

    return pl.pallas_call(
        partial(_mha_add_ln_kernel, 1.0 / math.sqrt(dh), eps, has_mask),
        out_shape=jax.ShapeDtypeStruct((B, S, D), x.dtype),
        grid=grid,
        in_specs=in_specs,
        out_specs=x_spec,
        scratch_shapes=[pltpu.VMEM((ts, D), jnp.float32)],
        compiler_params=pltpu.CompilerParams(
            dimension_semantics=("parallel", "parallel", "arbitrary"),
            vmem_limit_bytes=_vmem_limit(2 * blk)),
        cost_estimate=pl.CostEstimate(flops=flops, transcendentals=trans,
                                      bytes_accessed=bytes_acc),
    )(*args)
    # TODO(synk): for very long sequences, additionally tile the KV axis flash-style
    # (online softmax) to cap the (ts, T) score footprint; not needed at these shapes.


def ffn_add_layernorm(x, p, gamma, beta, eps=1e-5):
    """LayerNorm(FFN(x) + x)."""
    B, S, D = x.shape
    dff = p["w1"].shape[1]
    ts = _seq_tile(S)
    grid = (B, S // ts)

    wdt = jnp.bfloat16
    w1 = p["w1"].astype(wdt)
    w2 = p["w2"].astype(wdt)
    b1 = p["b1"].astype(jnp.float32).reshape(1, dff)
    b2 = p["b2"].astype(jnp.float32).reshape(1, D)
    g2 = gamma.astype(jnp.float32).reshape(1, D)
    be2 = beta.astype(jnp.float32).reshape(1, D)

    act_spec = pl.BlockSpec((1, ts, D), lambda b, s: (b, s, 0))

    blk = (2 * 2 * ts * D * 4 + 2 * (D * dff + dff * D) * 2
           + ts * dff * 4 + 2 * ts * D * 4)
    flops = int(4 * B * S * D * dff)
    bytes_acc = int(2 * B * S * D * 4 + 2 * D * dff * 2)

    return pl.pallas_call(
        partial(_ffn_add_ln_kernel, eps),
        out_shape=jax.ShapeDtypeStruct((B, S, D), x.dtype),
        grid=grid,
        in_specs=[act_spec,
                  pl.BlockSpec((D, dff), lambda b, s: (0, 0)),
                  pl.BlockSpec((1, dff), lambda b, s: (0, 0)),
                  pl.BlockSpec((dff, D), lambda b, s: (0, 0)),
                  pl.BlockSpec((1, D), lambda b, s: (0, 0)),
                  pl.BlockSpec((1, D), lambda b, s: (0, 0)),
                  pl.BlockSpec((1, D), lambda b, s: (0, 0))],
        out_specs=act_spec,
        compiler_params=pltpu.CompilerParams(
            dimension_semantics=("parallel", "parallel"),
            vmem_limit_bytes=_vmem_limit(2 * blk)),
        cost_estimate=pl.CostEstimate(flops=flops, transcendentals=0,
                                      bytes_accessed=bytes_acc),
    )(x, w1, b1, w2, b2, g2, be2)


# ----------------------------------------------------------------------------
# Decoder forward (glue in plain JAX, compute in fused Pallas kernels)
# ----------------------------------------------------------------------------
def transformer_decoder(x, encoder_kv, params, headnum, mask=None):
    tep = x
    for layer in params:
        # self attention + dropout(identity) + residual + LayerNorm (fused)
        tep = mha_add_layernorm(tep, tep, layer["att1"], layer["ln1_g"], layer["ln1_b"],
                                headnum, mask=mask)
        # cross attention (no mask) + dropout(identity) + residual + LayerNorm (fused)
        tep = mha_add_layernorm(tep, encoder_kv, layer["att2"], layer["ln2_g"], layer["ln2_b"],
                                headnum, mask=None)
        # feed forward + dropout(identity) + residual + LayerNorm (fused)
        tep = ffn_add_layernorm(tep, layer["ffn"], layer["ln3_g"], layer["ln3_b"])
    return tep
    # TODO(synk): dropout modeled as identity (eval mode); training-mode RNG dropout not implemented.


# ----------------------------------------------------------------------------
# pure-JAX reference (for correctness check)
# ----------------------------------------------------------------------------
def _mha_ref(x, kv, p, headnum, mask=None):
    B, S, D = x.shape
    dh = D // headnum
    q = x @ p["wq"] + p["bq"]
    k = kv @ p["wk"] + p["bk"]
    v = kv @ p["wv"] + p["bv"]

    def split(z):
        b, n, _ = z.shape
        return z.reshape(b, n, headnum, dh).transpose(0, 2, 1, 3)

    qh, kh, vh = split(q), split(k), split(v)
    s = jnp.einsum('bhqd,bhkd->bhqk', qh, kh) / math.sqrt(dh)
    if mask is not None:
        s = s + mask[None, None]
    a = jax.nn.softmax(s, axis=-1)
    ctx = jnp.einsum('bhqk,bhkd->bhqd', a, vh)
    ctx = ctx.transpose(0, 2, 1, 3).reshape(B, S, D)
    return ctx @ p["wo"] + p["bo"]


def _ln_ref(y, g, b, eps=1e-5):
    mu = y.mean(-1, keepdims=True)
    var = ((y - mu) ** 2).mean(-1, keepdims=True)
    return (y - mu) * lax.rsqrt(var + eps) * g + b


def decoder_ref(x, encoder_kv, params, headnum, mask=None):
    tep = x
    for layer in params:
        tep = _ln_ref(_mha_ref(tep, tep, layer["att1"], headnum, mask) + tep,
                      layer["ln1_g"], layer["ln1_b"])
        tep = _ln_ref(_mha_ref(tep, encoder_kv, layer["att2"], headnum) + tep,
                      layer["ln2_g"], layer["ln2_b"])
        f = layer["ffn"]
        h = jnp.maximum(tep @ f["w1"] + f["b1"], 0.0) @ f["w2"] + f["b2"]
        tep = _ln_ref(h + tep, layer["ln3_g"], layer["ln3_b"])
    return tep


# ----------------------------------------------------------------------------
# Deterministic parameter initialization
# ----------------------------------------------------------------------------
def _linear(key, din, dout):
    kw, kb = jax.random.split(key)
    w = 0.05 * jax.random.normal(kw, (din, dout), jnp.float32)
    b = 0.01 * jax.random.normal(kb, (dout,), jnp.float32)
    return w, b


def _attn_params(key, dmodel):
    ks = jax.random.split(key, 4)
    wq, bq = _linear(ks[0], dmodel, dmodel)
    wk, bk = _linear(ks[1], dmodel, dmodel)
    wv, bv = _linear(ks[2], dmodel, dmodel)
    wo, bo = _linear(ks[3], dmodel, dmodel)
    return {"wq": wq, "bq": bq, "wk": wk, "bk": bk,
            "wv": wv, "bv": bv, "wo": wo, "bo": bo}


def init_decoder_params(key, repeat_num, dmodel, dff):
    params = []
    for i in range(repeat_num):
        k = jax.random.fold_in(key, i)
        k1, k2, k3, k4 = jax.random.split(k, 4)
        w1, b1 = _linear(k3, dmodel, dff)
        w2, b2 = _linear(k4, dff, dmodel)
        params.append({
            "att1": _attn_params(k1, dmodel),
            "att2": _attn_params(k2, dmodel),
            "ffn": {"w1": w1, "b1": b1, "w2": w2, "b2": b2},
            "ln1_g": jnp.ones((dmodel,), jnp.float32), "ln1_b": jnp.zeros((dmodel,), jnp.float32),
            "ln2_g": jnp.ones((dmodel,), jnp.float32), "ln2_b": jnp.zeros((dmodel,), jnp.float32),
            "ln3_g": jnp.ones((dmodel,), jnp.float32), "ln3_b": jnp.zeros((dmodel,), jnp.float32),
        })
    return params


if __name__ == "__main__":
    # Small shapes consistent with the module (dmodel divisible by headnum).
    B, S, T = 2, 8, 8
    dmodel, dff, headnum, repeat_num = 32, 64, 4, 2
    assert dmodel % headnum == 0

    key = jax.random.PRNGKey(0)
    kx, kkv, kp = jax.random.split(key, 3)
    x = jax.random.normal(kx, (B, S, dmodel), jnp.float32)
    encoder_kv = jax.random.normal(kkv, (B, T, dmodel), jnp.float32)
    params = init_decoder_params(kp, repeat_num, dmodel, dff)

    # causal (look-ahead) additive mask for the self-attention path (finite, not -inf)
    causal = jnp.where(jnp.tril(jnp.ones((S, S), jnp.bool_)), 0.0, -1e9).astype(jnp.float32)

    fwd = jax.jit(partial(transformer_decoder, headnum=headnum))
    out = jax.block_until_ready(fwd(x, encoder_kv, params, mask=causal))
    ref = jax.block_until_ready(decoder_ref(x, encoder_kv, params, headnum, mask=causal))

    assert out.shape == (B, S, dmodel)
    assert bool(jnp.all(jnp.isfinite(out)))
    max_err = float(jnp.max(jnp.abs(out - ref)))
    assert max_err < 5e-2, f"max abs error vs reference too large: {max_err}"
    print("KERNEL_OK")
</pallas_src>

<mosaic_0001>
module attributes {stable_mosaic.version = 11 : i64} {
  func.func @_mha_add_ln_kernel(%arg0: i32, %arg1: i32, %arg2: i32, %arg3: memref<1x8x32xf32, #tpu.memory_space<vmem>>, %arg4: memref<1x8x32xf32, #tpu.memory_space<vmem>>, %arg5: memref<8x8xf32, #tpu.memory_space<vmem>>, %arg6: memref<1x32x8xbf16, #tpu.memory_space<vmem>>, %arg7: memref<1x1x8xf32, #tpu.memory_space<vmem>>, %arg8: memref<1x32x8xbf16, #tpu.memory_space<vmem>>, %arg9: memref<1x1x8xf32, #tpu.memory_space<vmem>>, %arg10: memref<1x32x8xbf16, #tpu.memory_space<vmem>>, %arg11: memref<1x1x8xf32, #tpu.memory_space<vmem>>, %arg12: memref<1x8x32xbf16, #tpu.memory_space<vmem>>, %arg13: memref<1x32xf32, #tpu.memory_space<vmem>>, %arg14: memref<1x32xf32, #tpu.memory_space<vmem>>, %arg15: memref<1x32xf32, #tpu.memory_space<vmem>>, %arg16: memref<1x8x32xf32, #tpu.memory_space<vmem>>, %arg17: memref<8x32xf32, #tpu.memory_space<vmem>>) attributes {dimension_semantics = [#tpu.dimension_semantics<parallel>, #tpu.dimension_semantics<parallel>, #tpu.dimension_semantics<arbitrary>], iteration_bounds = array<i64: 2, 1, 4>, scalar_prefetch = 0 : i64, scratch_operands = 1 : i64, tpu.core_type = #tpu.core_type<tc>, window_params = [{transform_indices = @transform_0, window_bounds = array<i64: 1, 8, 32>}, {transform_indices = @transform_1, window_bounds = array<i64: 1, 8, 32>}, {transform_indices = @transform_2, window_bounds = array<i64: 8, 8>}, {transform_indices = @transform_3, window_bounds = array<i64: 1, 32, 8>}, {transform_indices = @transform_4, window_bounds = array<i64: 1, 1, 8>}, {transform_indices = @transform_5, window_bounds = array<i64: 1, 32, 8>}, {transform_indices = @transform_6, window_bounds = array<i64: 1, 1, 8>}, {transform_indices = @transform_7, window_bounds = array<i64: 1, 32, 8>}, {transform_indices = @transform_8, window_bounds = array<i64: 1, 1, 8>}, {transform_indices = @transform_9, window_bounds = array<i64: 1, 8, 32>}, {pipeline_mode = #tpu.pipeline_mode<synchronous>, transform_indices = @transform_10, window_bounds = array<i64: 1, 32>}, {pipeline_mode = #tpu.pipeline_mode<synchronous>, transform_indices = @transform_11, window_bounds = array<i64: 1, 32>}, {pipeline_mode = #tpu.pipeline_mode<synchronous>, transform_indices = @transform_12, window_bounds = array<i64: 1, 32>}, {transform_indices = @transform_13, window_bounds = array<i64: 1, 8, 32>}]} {
    %c0_i32 = arith.constant 0 : i32
    %0 = arith.cmpi eq, %arg2, %c0_i32 : i32
    %1 = arith.extui %0 : i1 to i32
    %c0_i32_0 = arith.constant 0 : i32
    %2 = arith.cmpi ne, %1, %c0_i32_0 : i32
    scf.if %2 {
      %cst_42 = arith.constant 0.000000e+00 : f32
      %60 = vector.broadcast %cst_42 : f32 to vector<8x32xf32>
      %c0_43 = arith.constant 0 : index
      %c0_44 = arith.constant 0 : index
      %61 = vector.load %arg17[%c0_43, %c0_44] : memref<8x32xf32, #tpu.memory_space<vmem>>, vector<8x32xf32>
      tpu.vector_store %arg17[%c0_43, %c0_44], %60 {strides = array<i32>} : memref<8x32xf32, #tpu.memory_space<vmem>>, vector<8x32xf32>,
    } else {
    }
    %c0 = arith.constant 0 : index
    %c0_1 = arith.constant 0 : index
    %c0_2 = arith.constant 0 : index
    %3 = vector.load %arg3[%c0, %c0_1, %c0_2] : memref<1x8x32xf32, #tpu.memory_space<vmem>>, vector<1x8x32xf32>
    %4 = vector.shape_cast %3 : vector<1x8x32xf32> to vector<8x32xf32>
    %c0_3 = arith.constant 0 : index
    %c0_4 = arith.constant 0 : index
    %c0_5 = arith.constant 0 : index
    %5 = vector.load %arg4[%c0_3, %c0_4, %c0_5] : memref<1x8x32xf32, #tpu.memory_space<vmem>>, vector<1x8x32xf32>
    %6 = vector.shape_cast %5 : vector<1x8x32xf32> to vector<8x32xf32>
    %7 = arith.truncf %4 : vector<8x32xf32> to vector<8x32xbf16>
    %8 = arith.truncf %6 : vector<8x32xf32> to vector<8x32xbf16>
    %c0_6 = arith.constant 0 : index
    %c0_7 = arith.constant 0 : index
    %c0_8 = arith.constant 0 : index
    %9 = vector.load %arg6[%c0_6, %c0_7, %c0_8] : memref<1x32x8xbf16, #tpu.memory_space<vmem>>, vector<1x32x8xbf16>
    %10 = vector.shape_cast %9 : vector<1x32x8xbf16> to vector<32x8xbf16>
    %cst = arith.constant dense<0.000000e+00> : vector<8x8xf32>
    %11 = tpu.matmul %7, %10, %cst {dimension_numbers = #tpu.dot_dimension_numbers<[1], [0], [0], [1], [0, 0, 1, 1], [], []>} : vector<8x32xbf16>, vector<32x8xbf16>, vector<8x8xf32> -> vector<8x8xf32>
    %c0_9 = arith.constant 0 : index
    %c0_10 = arith.constant 0 : index
    %c0_11 = arith.constant 0 : index
    %12 = vector.load %arg7[%c0_9, %c0_10, %c0_11] : memref<1x1x8xf32, #tpu.memory_space<vmem>>, vector<1x1x8xf32>
    %13 = vector.shape_cast %12 : vector<1x1x8xf32> to vector<1x8xf32>
    %14 = vector.broadcast %13 : vector<1x8xf32> to vector<8x8xf32>
    %15 = arith.addf %11, %14 : vector<8x8xf32>
    %c0_12 = arith.constant 0 : index
    %c0_13 = arith.constant 0 : index
    %c0_14 = arith.constant 0 : index
    %16 = vector.load %arg8[%c0_12, %c0_13, %c0_14] : memref<1x32x8xbf16, #tpu.memory_space<vmem>>, vector<1x32x8xbf16>
    %17 = vector.shape_cast %16 : vector<1x32x8xbf16> to vector<32x8xbf16>
    %cst_15 = arith.constant dense<0.000000e+00> : vector<8x8xf32>
    %18 = tpu.matmul %8, %17, %cst_15 {dimension_numbers = #tpu.dot_dimension_numbers<[1], [0], [0], [1], [0, 0, 1, 1], [], []>} : vector<8x32xbf16>, vector<32x8xbf16>, vector<8x8xf32> -> vector<8x8xf32>
    %c0_16 = arith.constant 0 : index
    %c0_17 = arith.constant 0 : index
    %c0_18 = arith.constant 0 : index
    %19 = vector.load %arg9[%c0_16, %c0_17, %c0_18] : memref<1x1x8xf32, #tpu.memory_space<vmem>>, vector<1x1x8xf32>
    %20 = vector.shape_cast %19 : vector<1x1x8xf32> to vector<1x8xf32>
    %21 = vector.broadcast %20 : vector<1x8xf32> to vector<8x8xf32>
    %22 = arith.addf %18, %21 : vector<8x8xf32>
    %c0_19 = arith.constant 0 : index
    %c0_20 = arith.constant 0 : index
    %c0_21 = arith.constant 0 : index
    %23 = vector.load %arg10[%c0_19, %c0_20, %c0_21] : memref<1x32x8xbf16, #tpu.memory_space<vmem>>, vector<1x32x8xbf16>
    %24 = vector.shape_cast %23 : vector<1x32x8xbf16> to vector<32x8xbf16>
    %cst_22 = arith.constant dense<0.000000e+00> : vector<8x8xf32>
    %25 = tpu.matmul %8, %24, %cst_22 {dimension_numbers = #tpu.dot_dimension_numbers<[1], [0], [0], [1], [0, 0, 1, 1], [], []>} : vector<8x32xbf16>, vector<32x8xbf16>, vector<8x8xf32> -> vector<8x8xf32>
    %c0_23 = arith.constant 0 : index
    %c0_24 = arith.constant 0 : index
    %c0_25 = arith.constant 0 : index
    %26 = vector.load %arg11[%c0_23, %c0_24, %c0_25] : memref<1x1x8xf32, #tpu.memory_space<vmem>>, vector<1x1x8xf32>
    %27 = vector.shape_cast %26 : vector<1x1x8xf32> to vector<1x8xf32>
    %28 = vector.broadcast %27 : vector<1x8xf32> to vector<8x8xf32>
    %29 = arith.addf %25, %28 : vector<8x8xf32>
    %cst_26 = arith.constant 0.353553385 : f32
    %30 = vector.broadcast %cst_26 : f32 to vector<8x8xf32>
    %31 = arith.mulf %15, %30 : vector<8x8xf32>
    %32 = arith.truncf %31 : vector<8x8xf32> to vector<8x8xbf16>
    %33 = arith.truncf %22 : vector<8x8xf32> to vector<8x8xbf16>
    %cst_27 = arith.constant dense<0.000000e+00> : vector<8x8xf32>
    %34 = tpu.matmul %32, %33, %cst_27 {dimension_numbers = #tpu.dot_dimension_numbers<[1], [1], [0], [0], [0, 0, 1, 0], [], []>} : vector<8x8xbf16>, vector<8x8xbf16>, vector<8x8xf32> -> vector<8x8xf32>
    %c0_28 = arith.constant 0 : index
    %c0_29 = arith.constant 0 : index
    %35 = vector.load %arg5[%c0_28, %c0_29] : memref<8x8xf32, #tpu.memory_space<vmem>>, vector<8x8xf32>
    %36 = arith.addf %34, %35 : vector<8x8xf32>
    %cst_30 = arith.constant dense<0xFF800000> : vector<8xf32>
    %37 = vector.multi_reduction <maximumf>, %36, %cst_30 [1] : vector<8x8xf32> to vector<8xf32>
    %38 = vector.shape_cast %37 : vector<8xf32> to vector<8x1xf32>
    %39 = vector.broadcast %38 : vector<8x1xf32> to vector<8x8xf32>
    %40 = arith.subf %36, %39 : vector<8x8xf32>
    %41 = math.exp %40 : vector<8x8xf32>
    %cst_31 = arith.constant dense<0.000000e+00> : vector<8xf32>
    %42 = vector.multi_reduction <add>, %41, %cst_31 [1] : vector<8x8xf32> to vector<8xf32>
    %43 = vector.shape_cast %42 : vector<8xf32> to vector<8x1xf32>
    %44 = tpu.reciprocal %43 {approx = true} : vector<8x1xf32> -> vector<8x1xf32>
    %45 = vector.broadcast %44 : vector<8x1xf32> to vector<8x8xf32>
    %46 = arith.mulf %41, %45 : vector<8x8xf32>
    %47 = arith.truncf %46 : vector<8x8xf32> to vector<8x8xbf16>
    %48 = arith.truncf %29 : vector<8x8xf32> to vector<8x8xbf16>
    %cst_32 = arith.constant dense<0.000000e+00> : vector<8x8xf32>
    %49 = tpu.matmul %47, %48, %cst_32 {dimension_numbers = #tpu.dot_dimension_numbers<[1], [0], [0], [1], [0, 0, 1, 1], [], []>} : vector<8x8xbf16>, vector<8x8xbf16>, vector<8x8xf32> -> vector<8x8xf32>
    %c0_33 = arith.constant 0 : index
    %c0_34 = arith.constant 0 : index
    %50 = vector.load %arg17[%c0_33, %c0_34] : memref<8x32xf32, #tpu.memory_space<vmem>>, vector<8x32xf32>
    %51 = arith.truncf %49 : vector<8x8xf32> to vector<8x8xbf16>
    %c0_35 = arith.constant 0 : index
    %c0_36 = arith.constant 0 : index
    %c0_37 = arith.constant 0 : index
    %52 = vector.load %arg12[%c0_35, %c0_36, %c0_37] : memref<1x8x32xbf16, #tpu.memory_space<vmem>>, vector<1x8x32xbf16>
    %53 = vector.shape_cast %52 : vector<1x8x32xbf16> to vector<8x32xbf16>
    %cst_38 = arith.constant dense<0.000000e+00> : vector<8x32xf32>
    %54 = tpu.matmul %51, %53, %cst_38 {dimension_numbers = #tpu.dot_dimension_numbers<[1], [0], [0], [1], [0, 0, 1, 1], [], []>} : vector<8x8xbf16>, vector<8x32xbf16>, vector<8x32xf32> -> vector<8x32xf32>
    %55 = arith.addf %50, %54 : vector<8x32xf32>
    %c0_39 = arith.constant 0 : index
    %c0_40 = arith.constant 0 : index
    %56 = vector.load %arg17[%c0_39, %c0_40] : memref<8x32xf32, #tpu.memory_space<vmem>>, vector<8x32xf32>
    tpu.vector_store %arg17[%c0_39, %c0_40], %55 {strides = array<i32>} : memref<8x32xf32, #tpu.memory_space<vmem>>, vector<8x32xf32>,
    %c3_i32 = arith.constant 3 : i32
    %57 = arith.cmpi eq, %arg2, %c3_i32 : i32
    %58 = arith.extui %57 : i1 to i32
    %c0_i32_41 = arith.constant 0 : i32
    %59 = arith.cmpi ne, %58, %c0_i32_41 : i32
    scf.if %59 {
      %c0_42 = arith.constant 0 : index
      %c0_43 = arith.constant 0 : index
      %60 = vector.load %arg17[%c0_42, %c0_43] : memref<8x32xf32, #tpu.memory_space<vmem>>, vector<8x32xf32>
      %c0_44 = arith.constant 0 : index
      %c0_45 = arith.constant 0 : index
      %61 = vector.load %arg13[%c0_44, %c0_45] : memref<1x32xf32, #tpu.memory_space<vmem>>, vector<1x32xf32>
      %62 = vector.broadcast %61 : vector<1x32xf32> to vector<8x32xf32>
      %63 = arith.addf %60, %62 : vector<8x32xf32>
      %64 = arith.addf %63, %4 : vector<8x32xf32>
      %cst_46 = arith.constant dense<0.000000e+00> : vector<8xf32>
      %65 = vector.multi_reduction <add>, %64, %cst_46 [1] : vector<8x32xf32> to vector<8xf32>
      %66 = vector.shape_cast %65 : vector<8xf32> to vector<8x1xf32>
      %cst_47 = arith.constant 3.200000e+01 : f32
      %67 = vector.broadcast %cst_47 : f32 to vector<8x1xf32>
      %68 = arith.divf %66, %67 : vector<8x1xf32>
      %69 = vector.broadcast %68 : vector<8x1xf32> to vector<8x32xf32>
      %70 = arith.subf %64, %69 : vector<8x32xf32>
      %71 = arith.mulf %70, %70 : vector<8x32xf32>
      %cst_48 = arith.constant dense<0.000000e+00> : vector<8xf32>
      %72 = vector.multi_reduction <add>, %71, %cst_48 [1] : vector<8x32xf32> to vector<8xf32>
      %73 = vector.shape_cast %72 : vector<8xf32> to vector<8x1xf32>
      %cst_49 = arith.constant 3.200000e+01 : f32
      %74 = vector.broadcast %cst_49 : f32 to vector<8x1xf32>
      %75 = arith.divf %73, %74 : vector<8x1xf32>
      %76 = vector.broadcast %68 : vector<8x1xf32> to vector<8x32xf32>
      %77 = arith.subf %64, %76 : vector<8x32xf32>
      %cst_50 = arith.constant 9.99999974E-6 : f32
      %78 = vector.broadcast %cst_50 : f32 to vector<8x1xf32>
      %79 = arith.addf %75, %78 : vector<8x1xf32>
      %80 = math.rsqrt %79 : vector<8x1xf32>
      %81 = vector.broadcast %80 : vector<8x1xf32> to vector<8x32xf32>
      %82 = arith.mulf %77, %81 : vector<8x32xf32>
      %c0_51 = arith.constant 0 : index
      %c0_52 = arith.constant 0 : index
      %83 = vector.load %arg14[%c0_51, %c0_52] : memref<1x32xf32, #tpu.memory_space<vmem>>, vector<1x32xf32>
      %84 = vector.broadcast %83 : vector<1x32xf32> to vector<8x32xf32>
      %85 = arith.mulf %82, %84 : vector<8x32xf32>
      %c0_53 = arith.constant 0 : index
      %c0_54 = arith.constant 0 : index
      %86 = vector.load %arg15[%c0_53, %c0_54] : memref<1x32xf32, #tpu.memory_space<vmem>>, vector<1x32xf32>
      %87 = vector.broadcast %86 : vector<1x32xf32> to vector<8x32xf32>
      %88 = arith.addf %85, %87 : vector<8x32xf32>
      %c0_55 = arith.constant 0 : index
      %c0_56 = arith.constant 0 : index
      %c0_57 = arith.constant 0 : index
      %89 = vector.load %arg16[%c0_55, %c0_56, %c0_57] : memref<1x8x32xf32, #tpu.memory_space<vmem>>, vector<1x8x32xf32>
      %90 = vector.shape_cast %89 : vector<1x8x32xf32> to vector<8x32xf32>
      %91 = vector.shape_cast %88 : vector<8x32xf32> to vector<1x8x32xf32>
      tpu.vector_store %arg16[%c0_55, %c0_56, %c0_57], %91 {strides = array<i32>} : memref<1x8x32xf32, #tpu.memory_space<vmem>>, vector<1x8x32xf32>,
    } else {
    }
    return
  }
  func.func @transform_0(%arg0: i32, %arg1: i32, %arg2: i32) -> (i32, i32, i32) {
    %c0_i32 = arith.constant 0 : i32
    %c0_i32_0 = arith.constant 0 : i32
    return %arg0, %arg1, %c0_i32 : i32, i32, i32
  }
  func.func @transform_1(%arg0: i32, %arg1: i32, %arg2: i32) -> (i32, i32, i32) {
    %c0_i32 = arith.constant 0 : i32
    %c0_i32_0 = arith.constant 0 : i32
    %c0_i32_1 = arith.constant 0 : i32
    return %arg0, %c0_i32, %c0_i32_0 : i32, i32, i32
  }
  func.func @transform_2(%arg0: i32, %arg1: i32, %arg2: i32) -> (i32, i32) {
    %c0_i32 = arith.constant 0 : i32
    %c0_i32_0 = arith.constant 0 : i32
    return %arg1, %c0_i32 : i32, i32
  }
  func.func @transform_3(%arg0: i32, %arg1: i32, %arg2: i32) -> (i32, i32, i32) {
    %c0_i32 = arith.constant 0 : i32
    %c0_i32_0 = arith.constant 0 : i32
    %c0_i32_1 = arith.constant 0 : i32
    return %arg2, %c0_i32, %c0_i32_0 : i32, i32, i32
  }
  func.func @transform_4(%arg0: i32, %arg1: i32, %arg2: i32) -> (i32, i32, i32) {
    %c0_i32 = arith.constant 0 : i32
    %c0_i32_0 = arith.constant 0 : i32
    %c0_i32_1 = arith.constant 0 : i32
    return %arg2, %c0_i32, %c0_i32_0 : i32, i32, i32
  }
  func.func @transform_5(%arg0: i32, %arg1: i32, %arg2: i32) -> (i32, i32, i32) {
    %c0_i32 = arith.constant 0 : i32
    %c0_i32_0 = arith.constant 0 : i32
    %c0_i32_1 = arith.constant 0 : i32
    return %arg2, %c0_i32, %c0_i32_0 : i32, i32, i32
  }
  func.func @transform_6(%arg0: i32, %arg1: i32, %arg2: i32) -> (i32, i32, i32) {
    %c0_i32 = arith.constant 0 : i32
    %c0_i32_0 = arith.constant 0 : i32
    %c0_i32_1 = arith.constant 0 : i32
    return %arg2, %c0_i32, %c0_i32_0 : i32, i32, i32
  }
  func.func @transform_7(%arg0: i32, %arg1: i32, %arg2: i32) -> (i32, i32, i32) {
    %c0_i32 = arith.constant 0 : i32
    %c0_i32_0 = arith.constant 0 : i32
    %c0_i32_1 = arith.constant 0 : i32
    return %arg2, %c0_i32, %c0_i32_0 : i32, i32, i32
  }
  func.func @transform_8(%arg0: i32, %arg1: i32, %arg2: i32) -> (i32, i32, i32) {
    %c0_i32 = arith.constant 0 : i32
    %c0_i32_0 = arith.constant 0 : i32
    %c0_i32_1 = arith.constant 0 : i32
    return %arg2, %c0_i32, %c0_i32_0 : i32, i32, i32
  }
  func.func @transform_9(%arg0: i32, %arg1: i32, %arg2: i32) -> (i32, i32, i32) {
    %c0_i32 = arith.constant 0 : i32
    %c0_i32_0 = arith.constant 0 : i32
    %c0_i32_1 = arith.constant 0 : i32
    return %arg2, %c0_i32, %c0_i32_0 : i32, i32, i32
  }
  func.func @transform_10(%arg0: i32, %arg1: i32, %arg2: i32) -> (i32, i32) {
    %c0_i32 = arith.constant 0 : i32
    %c0_i32_0 = arith.constant 0 : i32
    %c0_i32_1 = arith.constant 0 : i32
    return %c0_i32, %c0_i32_0 : i32, i32
  }
  func.func @transform_11(%arg0: i32, %arg1: i32, %arg2: i32) -> (i32, i32) {
    %c0_i32 = arith.constant 0 : i32
    %c0_i32_0 = arith.constant 0 : i32
    %c0_i32_1 = arith.constant 0 : i32
    return %c0_i32, %c0_i32_0 : i32, i32
  }
  func.func @transform_12(%arg0: i32, %arg1: i32, %arg2: i32) -> (i32, i32) {
    %c0_i32 = arith.constant 0 : i32
    %c0_i32_0 = arith.constant 0 : i32
    %c0_i32_1 = arith.constant 0 : i32
    return %c0_i32, %c0_i32_0 : i32, i32
  }
  func.func @transform_13(%arg0: i32, %arg1: i32, %arg2: i32) -> (i32, i32, i32) {
    %c0_i32 = arith.constant 0 : i32
    %c0_i32_0 = arith.constant 0 : i32
    return %arg0, %arg1, %c0_i32 : i32, i32, i32
  }
}

module attributes {stable_mosaic.version = 11 : i64} {
  func.func @_mha_add_ln_kernel(%arg0: i32, %arg1: i32, %arg2: i32, %arg3: memref<1x8x32xf32, #tpu.memory_space<vmem>>, %arg4: memref<1x8x32xf32, #tpu.memory_space<vmem>>, %arg5: memref<1x32x8xbf16, #tpu.memory_space<vmem>>, %arg6: memref<1x1x8xf32, #tpu.memory_space<vmem>>, %arg7: memref<1x32x8xbf16, #tpu.memory_space<vmem>>, %arg8: memref<1x1x8xf32, #tpu.memory_space<vmem>>, %arg9: memref<1x32x8xbf16, #tpu.memory_space<vmem>>, %arg10: memref<1x1x8xf32, #tpu.memory_space<vmem>>, %arg11: memref<1x8x32xbf16, #tpu.memory_space<vmem>>, %arg12: memref<1x32xf32, #tpu.memory_space<vmem>>, %arg13: memref<1x32xf32, #tpu.memory_space<vmem>>, %arg14: memref<1x32xf32, #tpu.memory_space<vmem>>, %arg15: memref<1x8x32xf32, #tpu.memory_space<vmem>>, %arg16: memref<8x32xf32, #tpu.memory_space<vmem>>) attributes {dimension_semantics = [#tpu.dimension_semantics<parallel>, #tpu.dimension_semantics<parallel>, #tpu.dimension_semantics<arbitrary>], iteration_bounds = array<i64: 2, 1, 4>, scalar_prefetch = 0 : i64, scratch_operands = 1 : i64, tpu.core_type = #tpu.core_type<tc>, window_params = [{transform_indices = @transform_0, window_bounds = array<i64: 1, 8, 32>}, {transform_indices = @transform_1, window_bounds = array<i64: 1, 8, 32>}, {transform_indices = @transform_2, window_bounds = array<i64: 1, 32, 8>}, {transform_indices = @transform_3, window_bounds = array<i64: 1, 1, 8>}, {transform_indices = @transform_4, window_bounds = array<i64: 1, 32, 8>}, {transform_indices = @transform_5, window_bounds = array<i64: 1, 1, 8>}, {transform_indices = @transform_6, window_bounds = array<i64: 1, 32, 8>}, {transform_indices = @transform_7, window_bounds = array<i64: 1, 1, 8>}, {transform_indices = @transform_8, window_bounds = array<i64: 1, 8, 32>}, {pipeline_mode = #tpu.pipeline_mode<synchronous>, transform_indices = @transform_9, window_bounds = array<i64: 1, 32>}, {pipeline_mode = #tpu.pipeline_mode<synchronous>, transform_indices = @transform_10, window_bounds = array<i64: 1, 32>}, {pipeline_mode = #tpu.pipeline_mode<synchronous>, transform_indices = @transform_11, window_bounds = array<i64: 1, 32>}, {transform_indices = @transform_12, window_bounds = array<i64: 1, 8, 32>}]} {
    %c0_i32 = arith.constant 0 : i32
    %0 = arith.cmpi eq, %arg2, %c0_i32 : i32
    %1 = arith.extui %0 : i1 to i32
    %c0_i32_0 = arith.constant 0 : i32
    %2 = arith.cmpi ne, %1, %c0_i32_0 : i32
    scf.if %2 {
      %cst_40 = arith.constant 0.000000e+00 : f32
      %58 = vector.broadcast %cst_40 : f32 to vector<8x32xf32>
      %c0_41 = arith.constant 0 : index
      %c0_42 = arith.constant 0 : index
      %59 = vector.load %arg16[%c0_41, %c0_42] : memref<8x32xf32, #tpu.memory_space<vmem>>, vector<8x32xf32>
      tpu.vector_store %arg16[%c0_41, %c0_42], %58 {strides = array<i32>} : memref<8x32xf32, #tpu.memory_space<vmem>>, vector<8x32xf32>,
    } else {
    }
    %c0 = arith.constant 0 : index
    %c0_1 = arith.constant 0 : index
    %c0_2 = arith.constant 0 : index
    %3 = vector.load %arg3[%c0, %c0_1, %c0_2] : memref<1x8x32xf32, #tpu.memory_space<vmem>>, vector<1x8x32xf32>
    %4 = vector.shape_cast %3 : vector<1x8x32xf32> to vector<8x32xf32>
    %c0_3 = arith.constant 0 : index
    %c0_4 = arith.constant 0 : index
    %c0_5 = arith.constant 0 : index
    %5 = vector.load %arg4[%c0_3, %c0_4, %c0_5] : memref<1x8x32xf32, #tpu.memory_space<vmem>>, vector<1x8x32xf32>
    %6 = vector.shape_cast %5 : vector<1x8x32xf32> to vector<8x32xf32>
    %7 = arith.truncf %4 : vector<8x32xf32> to vector<8x32xbf16>
    %8 = arith.truncf %6 : vector<8x32xf32> to vector<8x32xbf16>
    %c0_6 = arith.constant 0 : index
    %c0_7 = arith.constant 0 : index
    %c0_8 = arith.constant 0 : index
    %9 = vector.load %arg5[%c0_6, %c0_7, %c0_8] : memref<1x32x8xbf16, #tpu.memory_space<vmem>>, vector<1x32x8xbf16>
    %10 = vector.shape_cast %9 : vector<1x32x8xbf16> to vector<32x8xbf16>
    %cst = arith.constant dense<0.000000e+00> : vector<8x8xf32>
    %11 = tpu.matmul %7, %10, %cst {dimension_numbers = #tpu.dot_dimension_numbers<[1], [0], [0], [1], [0, 0, 1, 1], [], []>} : vector<8x32xbf16>, vector<32x8xbf16>, vector<8x8xf32> -> vector<8x8xf32>
    %c0_9 = arith.constant 0 : index
    %c0_10 = arith.constant 0 : index
    %c0_11 = arith.constant 0 : index
    %12 = vector.load %arg6[%c0_9, %c0_10, %c0_11] : memref<1x1x8xf32, #tpu.memory_space<vmem>>, vector<1x1x8xf32>
    %13 = vector.shape_cast %12 : vector<1x1x8xf32> to vector<1x8xf32>
    %14 = vector.broadcast %13 : vector<1x8xf32> to vector<8x8xf32>
    %15 = arith.addf %11, %14 : vector<8x8xf32>
    %c0_12 = arith.constant 0 : index
    %c0_13 = arith.constant 0 : index
    %c0_14 = arith.constant 0 : index
    %16 = vector.load %arg7[%c0_12, %c0_13, %c0_14] : memref<1x32x8xbf16, #tpu.memory_space<vmem>>, vector<1x32x8xbf16>
    %17 = vector.shape_cast %16 : vector<1x32x8xbf16> to vector<32x8xbf16>
    %cst_15 = arith.constant dense<0.000000e+00> : vector<8x8xf32>
    %18 = tpu.matmul %8, %17, %cst_15 {dimension_numbers = #tpu.dot_dimension_numbers<[1], [0], [0], [1], [0, 0, 1, 1], [], []>} : vector<8x32xbf16>, vector<32x8xbf16>, vector<8x8xf32> -> vector<8x8xf32>
    %c0_16 = arith.constant 0 : index
    %c0_17 = arith.constant 0 : index
    %c0_18 = arith.constant 0 : index
    %19 = vector.load %arg8[%c0_16, %c0_17, %c0_18] : memref<1x1x8xf32, #tpu.memory_space<vmem>>, vector<1x1x8xf32>
    %20 = vector.shape_cast %19 : vector<1x1x8xf32> to vector<1x8xf32>
    %21 = vector.broadcast %20 : vector<1x8xf32> to vector<8x8xf32>
    %22 = arith.addf %18, %21 : vector<8x8xf32>
    %c0_19 = arith.constant 0 : index
    %c0_20 = arith.constant 0 : index
    %c0_21 = arith.constant 0 : index
    %23 = vector.load %arg9[%c0_19, %c0_20, %c0_21] : memref<1x32x8xbf16, #tpu.memory_space<vmem>>, vector<1x32x8xbf16>
    %24 = vector.shape_cast %23 : vector<1x32x8xbf16> to vector<32x8xbf16>
    %cst_22 = arith.constant dense<0.000000e+00> : vector<8x8xf32>
    %25 = tpu.matmul %8, %24, %cst_22 {dimension_numbers = #tpu.dot_dimension_numbers<[1], [0], [0], [1], [0, 0, 1, 1], [], []>} : vector<8x32xbf16>, vector<32x8xbf16>, vector<8x8xf32> -> vector<8x8xf32>
    %c0_23 = arith.constant 0 : index
    %c0_24 = arith.constant 0 : index
    %c0_25 = arith.constant 0 : index
    %26 = vector.load %arg10[%c0_23, %c0_24, %c0_25] : memref<1x1x8xf32, #tpu.memory_space<vmem>>, vector<1x1x8xf32>
    %27 = vector.shape_cast %26 : vector<1x1x8xf32> to vector<1x8xf32>
    %28 = vector.broadcast %27 : vector<1x8xf32> to vector<8x8xf32>
    %29 = arith.addf %25, %28 : vector<8x8xf32>
    %cst_26 = arith.constant 0.353553385 : f32
    %30 = vector.broadcast %cst_26 : f32 to vector<8x8xf32>
    %31 = arith.mulf %15, %30 : vector<8x8xf32>
    %32 = arith.truncf %31 : vector<8x8xf32> to vector<8x8xbf16>
    %33 = arith.truncf %22 : vector<8x8xf32> to vector<8x8xbf16>
    %cst_27 = arith.constant dense<0.000000e+00> : vector<8x8xf32>
    %34 = tpu.matmul %32, %33, %cst_27 {dimension_numbers = #tpu.dot_dimension_numbers<[1], [1], [0], [0], [0, 0, 1, 0], [], []>} : vector<8x8xbf16>, vector<8x8xbf16>, vector<8x8xf32> -> vector<8x8xf32>
    %cst_28 = arith.constant dense<0xFF800000> : vector<8xf32>
    %35 = vector.multi_reduction <maximumf>, %34, %cst_28 [1] : vector<8x8xf32> to vector<8xf32>
    %36 = vector.shape_cast %35 : vector<8xf32> to vector<8x1xf32>
    %37 = vector.broadcast %36 : vector<8x1xf32> to vector<8x8xf32>
    %38 = arith.subf %34, %37 : vector<8x8xf32>
    %39 = math.exp %38 : vector<8x8xf32>
    %cst_29 = arith.constant dense<0.000000e+00> : vector<8xf32>
    %40 = vector.multi_reduction <add>, %39, %cst_29 [1] : vector<8x8xf32> to vector<8xf32>
    %41 = vector.shape_cast %40 : vector<8xf32> to vector<8x1xf32>
    %42 = tpu.reciprocal %41 {approx = true} : vector<8x1xf32> -> vector<8x1xf32>
    %43 = vector.broadcast %42 : vector<8x1xf32> to vector<8x8xf32>
    %44 = arith.mulf %39, %43 : vector<8x8xf32>
    %45 = arith.truncf %44 : vector<8x8xf32> to vector<8x8xbf16>
    %46 = arith.truncf %29 : vector<8x8xf32> to vector<8x8xbf16>
    %cst_30 = arith.constant dense<0.000000e+00> : vector<8x8xf32>
    %47 = tpu.matmul %45, %46, %cst_30 {dimension_numbers = #tpu.dot_dimension_numbers<[1], [0], [0], [1], [0, 0, 1, 1], [], []>} : vector<8x8xbf16>, vector<8x8xbf16>, vector<8x8xf32> -> vector<8x8xf32>
    %c0_31 = arith.constant 0 : index
    %c0_32 = arith.constant 0 : index
    %48 = vector.load %arg16[%c0_31, %c0_32] : memref<8x32xf32, #tpu.memory_space<vmem>>, vector<8x32xf32>
    %49 = arith.truncf %47 : vector<8x8xf32> to vector<8x8xbf16>
    %c0_33 = arith.constant 0 : index
    %c0_34 = arith.constant 0 : index
    %c0_35 = arith.constant 0 : index
    %50 = vector.load %arg11[%c0_33, %c0_34, %c0_35] : memref<1x8x32xbf16, #tpu.memory_space<vmem>>, vector<1x8x32xbf16>
    %51 = vector.shape_cast %50 : vector<1x8x32xbf16> to vector<8x32xbf16>
    %cst_36 = arith.constant dense<0.000000e+00> : vector<8x32xf32>
    %52 = tpu.matmul %49, %51, %cst_36 {dimension_numbers = #tpu.dot_dimension_numbers<[1], [0], [0], [1], [0, 0, 1, 1], [], []>} : vector<8x8xbf16>, vector<8x32xbf16>, vector<8x32xf32> -> vector<8x32xf32>
    %53 = arith.addf %48, %52 : vector<8x32xf32>
    %c0_37 = arith.constant 0 : index
    %c0_38 = arith.constant 0 : index
    %54 = vector.load %arg16[%c0_37, %c0_38] : memref<8x32xf32, #tpu.memory_space<vmem>>, vector<8x32xf32>
    tpu.vector_store %arg16[%c0_37, %c0_38], %53 {strides = array<i32>} : memref<8x32xf32, #tpu.memory_space<vmem>>, vector<8x32xf32>,
    %c3_i32 = arith.constant 3 : i32
    %55 = arith.cmpi eq, %arg2, %c3_i32 : i32
    %56 = arith.extui %55 : i1 to i32
    %c0_i32_39 = arith.constant 0 : i32
    %57 = arith.cmpi ne, %56, %c0_i32_39 : i32
    scf.if %57 {
      %c0_40 = arith.constant 0 : index
      %c0_41 = arith.constant 0 : index
      %58 = vector.load %arg16[%c0_40, %c0_41] : memref<8x32xf32, #tpu.memory_space<vmem>>, vector<8x32xf32>
      %c0_42 = arith.constant 0 : index
      %c0_43 = arith.constant 0 : index
      %59 = vector.load %arg12[%c0_42, %c0_43] : memref<1x32xf32, #tpu.memory_space<vmem>>, vector<1x32xf32>
      %60 = vector.broadcast %59 : vector<1x32xf32> to vector<8x32xf32>
      %61 = arith.addf %58, %60 : vector<8x32xf32>
      %62 = arith.addf %61, %4 : vector<8x32xf32>
      %cst_44 = arith.constant dense<0.000000e+00> : vector<8xf32>
      %63 = vector.multi_reduction <add>, %62, %cst_44 [1] : vector<8x32xf32> to vector<8xf32>
      %64 = vector.shape_cast %63 : vector<8xf32> to vector<8x1xf32>
      %cst_45 = arith.constant 3.200000e+01 : f32
      %65 = vector.broadcast %cst_45 : f32 to vector<8x1xf32>
      %66 = arith.divf %64, %65 : vector<8x1xf32>
      %67 = vector.broadcast %66 : vector<8x1xf32> to vector<8x32xf32>
      %68 = arith.subf %62, %67 : vector<8x32xf32>
      %69 = arith.mulf %68, %68 : vector<8x32xf32>
      %cst_46 = arith.constant dense<0.000000e+00> : vector<8xf32>
      %70 = vector.multi_reduction <add>, %69, %cst_46 [1] : vector<8x32xf32> to vector<8xf32>
      %71 = vector.shape_cast %70 : vector<8xf32> to vector<8x1xf32>
      %cst_47 = arith.constant 3.200000e+01 : f32
      %72 = vector.broadcast %cst_47 : f32 to vector<8x1xf32>
      %73 = arith.divf %71, %72 : vector<8x1xf32>
      %74 = vector.broadcast %66 : vector<8x1xf32> to vector<8x32xf32>
      %75 = arith.subf %62, %74 : vector<8x32xf32>
      %cst_48 = arith.constant 9.99999974E-6 : f32
      %76 = vector.broadcast %cst_48 : f32 to vector<8x1xf32>
      %77 = arith.addf %73, %76 : vector<8x1xf32>
      %78 = math.rsqrt %77 : vector<8x1xf32>
      %79 = vector.broadcast %78 : vector<8x1xf32> to vector<8x32xf32>
      %80 = arith.mulf %75, %79 : vector<8x32xf32>
      %c0_49 = arith.constant 0 : index
      %c0_50 = arith.constant 0 : index
      %81 = vector.load %arg13[%c0_49, %c0_50] : memref<1x32xf32, #tpu.memory_space<vmem>>, vector<1x32xf32>
      %82 = vector.broadcast %81 : vector<1x32xf32> to vector<8x32xf32>
      %83 = arith.mulf %80, %82 : vector<8x32xf32>
      %c0_51 = arith.constant 0 : index
      %c0_52 = arith.constant 0 : index
      %84 = vector.load %arg14[%c0_51, %c0_52] : memref<1x32xf32, #tpu.memory_space<vmem>>, vector<1x32xf32>
      %85 = vector.broadcast %84 : vector<1x32xf32> to vector<8x32xf32>
      %86 = arith.addf %83, %85 : vector<8x32xf32>
      %c0_53 = arith.constant 0 : index
      %c0_54 = arith.constant 0 : index
      %c0_55 = arith.constant 0 : index
      %87 = vector.load %arg15[%c0_53, %c0_54, %c0_55] : memref<1x8x32xf32, #tpu.memory_space<vmem>>, vector<1x8x32xf32>
      %88 = vector.shape_cast %87 : vector<1x8x32xf32> to vector<8x32xf32>
      %89 = vector.shape_cast %86 : vector<8x32xf32> to vector<1x8x32xf32>
      tpu.vector_store %arg15[%c0_53, %c0_54, %c0_55], %89 {strides = array<i32>} : memref<1x8x32xf32, #tpu.memory_space<vmem>>, vector<1x8x32xf32>,
    } else {
    }
    return
  }
  func.func @transform_0(%arg0: i32, %arg1: i32, %arg2: i32) -> (i32, i32, i32) {
    %c0_i32 = arith.constant 0 : i32
    %c0_i32_0 = arith.constant 0 : i32
    return %arg0, %arg1, %c0_i32 : i32, i32, i32
  }
  func.func @transform_1(%arg0: i32, %arg1: i32, %arg2: i32) -> (i32, i32, i32) {
    %c0_i32 = arith.constant 0 : i32
    %c0_i32_0 = arith.constant 0 : i32
    %c0_i32_1 = arith.constant 0 : i32
    return %arg0, %c0_i32, %c0_i32_0 : i32, i32, i32
  }
  func.func @transform_2(%arg0: i32, %arg1: i32, %arg2: i32) -> (i32, i32, i32) {
    %c0_i32 = arith.constant 0 : i32
    %c0_i32_0 = arith.constant 0 : i32
    %c0_i32_1 = arith.constant 0 : i32
    return %arg2, %c0_i32, %c0_i32_0 : i32, i32, i32
  }
  func.func @transform_3(%arg0: i32, %arg1: i32, %arg2: i32) -> (i32, i32, i32) {
    %c0_i32 = arith.constant 0 : i32
    %c0_i32_0 = arith.constant 0 : i32
    %c0_i32_1 = arith.constant 0 : i32
    return %arg2, %c0_i32, %c0_i32_0 : i32, i32, i32
  }
  func.func @transform_4(%arg0: i32, %arg1: i32, %arg2: i32) -> (i32, i32, i32) {
    %c0_i32 = arith.constant 0 : i32
    %c0_i32_0 = arith.constant 0 : i32
    %c0_i32_1 = arith.constant 0 : i32
    return %arg2, %c0_i32, %c0_i32_0 : i32, i32, i32
  }
  func.func @transform_5(%arg0: i32, %arg1: i32, %arg2: i32) -> (i32, i32, i32) {
    %c0_i32 = arith.constant 0 : i32
    %c0_i32_0 = arith.constant 0 : i32
    %c0_i32_1 = arith.constant 0 : i32
    return %arg2, %c0_i32, %c0_i32_0 : i32, i32, i32
  }
  func.func @transform_6(%arg0: i32, %arg1: i32, %arg2: i32) -> (i32, i32, i32) {
    %c0_i32 = arith.constant 0 : i32
    %c0_i32_0 = arith.constant 0 : i32
    %c0_i32_1 = arith.constant 0 : i32
    return %arg2, %c0_i32, %c0_i32_0 : i32, i32, i32
  }
  func.func @transform_7(%arg0: i32, %arg1: i32, %arg2: i32) -> (i32, i32, i32) {
    %c0_i32 = arith.constant 0 : i32
    %c0_i32_0 = arith.constant 0 : i32
    %c0_i32_1 = arith.constant 0 : i32
    return %arg2, %c0_i32, %c0_i32_0 : i32, i32, i32
  }
  func.func @transform_8(%arg0: i32, %arg1: i32, %arg2: i32) -> (i32, i32, i32) {
    %c0_i32 = arith.constant 0 : i32
    %c0_i32_0 = arith.constant 0 : i32
    %c0_i32_1 = arith.constant 0 : i32
    return %arg2, %c0_i32, %c0_i32_0 : i32, i32, i32
  }
  func.func @transform_9(%arg0: i32, %arg1: i32, %arg2: i32) -> (i32, i32) {
    %c0_i32 = arith.constant 0 : i32
    %c0_i32_0 = arith.constant 0 : i32
    %c0_i32_1 = arith.constant 0 : i32
    return %c0_i32, %c0_i32_0 : i32, i32
  }
  func.func @transform_10(%arg0: i32, %arg1: i32, %arg2: i32) -> (i32, i32) {
    %c0_i32 = arith.constant 0 : i32
    %c0_i32_0 = arith.constant 0 : i32
    %c0_i32_1 = arith.constant 0 : i32
    return %c0_i32, %c0_i32_0 : i32, i32
  }
  func.func @transform_11(%arg0: i32, %arg1: i32, %arg2: i32) -> (i32, i32) {
    %c0_i32 = arith.constant 0 : i32
    %c0_i32_0 = arith.constant 0 : i32
    %c0_i32_1 = arith.constant 0 : i32
    return %c0_i32, %c0_i32_0 : i32, i32
  }
  func.func @transform_12(%arg0: i32, %arg1: i32, %arg2: i32) -> (i32, i32, i32) {
    %c0_i32 = arith.constant 0 : i32
    %c0_i32_0 = arith.constant 0 : i32
    return %arg0, %arg1, %c0_i32 : i32, i32, i32
  }
}

module attributes {stable_mosaic.version = 11 : i64} {
  func.func @_ffn_add_ln_kernel(%arg0: i32, %arg1: i32, %arg2: memref<1x8x32xf32, #tpu.memory_space<vmem>>, %arg3: memref<32x64xbf16, #tpu.memory_space<vmem>>, %arg4: memref<1x64xf32, #tpu.memory_space<vmem>>, %arg5: memref<64x32xbf16, #tpu.memory_space<vmem>>, %arg6: memref<1x32xf32, #tpu.memory_space<vmem>>, %arg7: memref<1x32xf32, #tpu.memory_space<vmem>>, %arg8: memref<1x32xf32, #tpu.memory_space<vmem>>, %arg9: memref<1x8x32xf32, #tpu.memory_space<vmem>>) attributes {dimension_semantics = [#tpu.dimension_semantics<parallel>, #tpu.dimension_semantics<parallel>], iteration_bounds = array<i64: 2, 1>, scalar_prefetch = 0 : i64, scratch_operands = 0 : i64, tpu.core_type = #tpu.core_type<tc>, window_params = [{transform_indices = @transform_0, window_bounds = array<i64: 1, 8, 32>}, {pipeline_mode = #tpu.pipeline_mode<synchronous>, transform_indices = @transform_1, window_bounds = array<i64: 32, 64>}, {pipeline_mode = #tpu.pipeline_mode<synchronous>, transform_indices = @transform_2, window_bounds = array<i64: 1, 64>}, {pipeline_mode = #tpu.pipeline_mode<synchronous>, transform_indices = @transform_3, window_bounds = array<i64: 64, 32>}, {pipeline_mode = #tpu.pipeline_mode<synchronous>, transform_indices = @transform_4, window_bounds = array<i64: 1, 32>}, {pipeline_mode = #tpu.pipeline_mode<synchronous>, transform_indices = @transform_5, window_bounds = array<i64: 1, 32>}, {pipeline_mode = #tpu.pipeline_mode<synchronous>, transform_indices = @transform_6, window_bounds = array<i64: 1, 32>}, {transform_indices = @transform_7, window_bounds = array<i64: 1, 8, 32>}]} {
    %c0 = arith.constant 0 : index
    %c0_0 = arith.constant 0 : index
    %c0_1 = arith.constant 0 : index
    %0 = vector.load %arg2[%c0, %c0_0, %c0_1] : memref<1x8x32xf32, #tpu.memory_space<vmem>>, vector<1x8x32xf32>
    %1 = vector.shape_cast %0 : vector<1x8x32xf32> to vector<8x32xf32>
    %2 = arith.truncf %1 : vector<8x32xf32> to vector<8x32xbf16>
    %c0_2 = arith.constant 0 : index
    %c0_3 = arith.constant 0 : index
    %3 = vector.load %arg3[%c0_2, %c0_3] : memref<32x64xbf16, #tpu.memory_space<vmem>>, vector<32x64xbf16>
    %cst = arith.constant dense<0.000000e+00> : vector<8x64xf32>
    %4 = tpu.matmul %2, %3, %cst {dimension_numbers = #tpu.dot_dimension_numbers<[1], [0], [0], [1], [0, 0, 1, 1], [], []>} : vector<8x32xbf16>, vector<32x64xbf16>, vector<8x64xf32> -> vector<8x64xf32>
    %c0_4 = arith.constant 0 : index
    %c0_5 = arith.constant 0 : index
    %5 = vector.load %arg4[%c0_4, %c0_5] : memref<1x64xf32, #tpu.memory_space<vmem>>, vector<1x64xf32>
    %6 = vector.broadcast %5 : vector<1x64xf32> to vector<8x64xf32>
    %7 = arith.addf %4, %6 : vector<8x64xf32>
    %cst_6 = arith.constant 0.000000e+00 : f32
    %8 = vector.broadcast %cst_6 : f32 to vector<8x64xf32>
    %9 = arith.maximumf %7, %8 : vector<8x64xf32>
    %10 = arith.truncf %9 : vector<8x64xf32> to vector<8x64xbf16>
    %c0_7 = arith.constant 0 : index
    %c0_8 = arith.constant 0 : index
    %11 = vector.load %arg5[%c0_7, %c0_8] : memref<64x32xbf16, #tpu.memory_space<vmem>>, vector<64x32xbf16>
    %cst_9 = arith.constant dense<0.000000e+00> : vector<8x32xf32>
    %12 = tpu.matmul %10, %11, %cst_9 {dimension_numbers = #tpu.dot_dimension_numbers<[1], [0], [0], [1], [0, 0, 1, 1], [], []>} : vector<8x64xbf16>, vector<64x32xbf16>, vector<8x32xf32> -> vector<8x32xf32>
    %c0_10 = arith.constant 0 : index
    %c0_11 = arith.constant 0 : index
    %13 = vector.load %arg6[%c0_10, %c0_11] : memref<1x32xf32, #tpu.memory_space<vmem>>, vector<1x32xf32>
    %14 = vector.broadcast %13 : vector<1x32xf32> to vector<8x32xf32>
    %15 = arith.addf %12, %14 : vector<8x32xf32>
    %16 = arith.addf %15, %1 : vector<8x32xf32>
    %cst_12 = arith.constant dense<0.000000e+00> : vector<8xf32>
    %17 = vector.multi_reduction <add>, %16, %cst_12 [1] : vector<8x32xf32> to vector<8xf32>
    %18 = vector.shape_cast %17 : vector<8xf32> to vector<8x1xf32>
    %cst_13 = arith.constant 3.200000e+01 : f32
    %19 = vector.broadcast %cst_13 : f32 to vector<8x1xf32>
    %20 = arith.divf %18, %19 : vector<8x1xf32>
    %21 = vector.broadcast %20 : vector<8x1xf32> to vector<8x32xf32>
    %22 = arith.subf %16, %21 : vector<8x32xf32>
    %23 = arith.mulf %22, %22 : vector<8x32xf32>
    %cst_14 = arith.constant dense<0.000000e+00> : vector<8xf32>
    %24 = vector.multi_reduction <add>, %23, %cst_14 [1] : vector<8x32xf32> to vector<8xf32>
    %25 = vector.shape_cast %24 : vector<8xf32> to vector<8x1xf32>
    %cst_15 = arith.constant 3.200000e+01 : f32
    %26 = vector.broadcast %cst_15 : f32 to vector<8x1xf32>
    %27 = arith.divf %25, %26 : vector<8x1xf32>
    %28 = vector.broadcast %20 : vector<8x1xf32> to vector<8x32xf32>
    %29 = arith.subf %16, %28 : vector<8x32xf32>
    %cst_16 = arith.constant 9.99999974E-6 : f32
    %30 = vector.broadcast %cst_16 : f32 to vector<8x1xf32>
    %31 = arith.addf %27, %30 : vector<8x1xf32>
    %32 = math.rsqrt %31 : vector<8x1xf32>
    %33 = vector.broadcast %32 : vector<8x1xf32> to vector<8x32xf32>
    %34 = arith.mulf %29, %33 : vector<8x32xf32>
    %c0_17 = arith.constant 0 : index
    %c0_18 = arith.constant 0 : index
    %35 = vector.load %arg7[%c0_17, %c0_18] : memref<1x32xf32, #tpu.memory_space<vmem>>, vector<1x32xf32>
    %36 = vector.broadcast %35 : vector<1x32xf32> to vector<8x32xf32>
    %37 = arith.mulf %34, %36 : vector<8x32xf32>
    %c0_19 = arith.constant 0 : index
    %c0_20 = arith.constant 0 : index
    %38 = vector.load %arg8[%c0_19, %c0_20] : memref<1x32xf32, #tpu.memory_space<vmem>>, vector<1x32xf32>
    %39 = vector.broadcast %38 : vector<1x32xf32> to vector<8x32xf32>
    %40 = arith.addf %37, %39 : vector<8x32xf32>
    %c0_21 = arith.constant 0 : index
    %c0_22 = arith.constant 0 : index
    %c0_23 = arith.constant 0 : index
    %41 = vector.load %arg9[%c0_21, %c0_22, %c0_23] : memref<1x8x32xf32, #tpu.memory_space<vmem>>, vector<1x8x32xf32>
    %42 = vector.shape_cast %41 : vector<1x8x32xf32> to vector<8x32xf32>
    %43 = vector.shape_cast %40 : vector<8x32xf32> to vector<1x8x32xf32>
    tpu.vector_store %arg9[%c0_21, %c0_22, %c0_23], %43 {strides = array<i32>} : memref<1x8x32xf32, #tpu.memory_space<vmem>>, vector<1x8x32xf32>,
    return
  }
  func.func @transform_0(%arg0: i32, %arg1: i32) -> (i32, i32, i32) {
    %c0_i32 = arith.constant 0 : i32
    %c0_i32_0 = arith.constant 0 : i32
    return %arg0, %arg1, %c0_i32 : i32, i32, i32
  }
  func.func @transform_1(%arg0: i32, %arg1: i32) -> (i32, i32) {
    %c0_i32 = arith.constant 0 : i32
    %c0_i32_0 = arith.constant 0 : i32
    %c0_i32_1 = arith.constant 0 : i32
    return %c0_i32, %c0_i32_0 : i32, i32
  }
  func.func @transform_2(%arg0: i32, %arg1: i32) -> (i32, i32) {
    %c0_i32 = arith.constant 0 : i32
    %c0_i32_0 = arith.constant 0 : i32
    %c0_i32_1 = arith.constant 0 : i32
    return %c0_i32, %c0_i32_0 : i32, i32
  }
  func.func @transform_3(%arg0: i32, %arg1: i32) -> (i32, i32) {
    %c0_i32 = arith.constant 0 : i32
    %c0_i32_0 = arith.constant 0 : i32
    %c0_i32_1 = arith.constant 0 : i32
    return %c0_i32, %c0_i32_0 : i32, i32
  }
  func.func @transform_4(%arg0: i32, %arg1: i32) -> (i32, i32) {
    %c0_i32 = arith.constant 0 : i32
    %c0_i32_0 = arith.constant 0 : i32
    %c0_i32_1 = arith.constant 0 : i32
    return %c0_i32, %c0_i32_0 : i32, i32
  }
  func.func @transform_5(%arg0: i32, %arg1: i32) -> (i32, i32) {
    %c0_i32 = arith.constant 0 : i32
    %c0_i32_0 = arith.constant 0 : i32
    %c0_i32_1 = arith.constant 0 : i32
    return %c0_i32, %c0_i32_0 : i32, i32
  }
  func.func @transform_6(%arg0: i32, %arg1: i32) -> (i32, i32) {
    %c0_i32 = arith.constant 0 : i32
    %c0_i32_0 = arith.constant 0 : i32
    %c0_i32_1 = arith.constant 0 : i32
    return %c0_i32, %c0_i32_0 : i32, i32
  }
  func.func @transform_7(%arg0: i32, %arg1: i32) -> (i32, i32, i32) {
    %c0_i32 = arith.constant 0 : i32
    %c0_i32_0 = arith.constant 0 : i32
    return %arg0, %arg1, %c0_i32 : i32, i32, i32
  }
}

module attributes {stable_mosaic.version = 11 : i64} {
  func.func @_ffn_add_ln_kernel(%arg0: i32, %arg1: i32, %arg2: memref<1x8x32xf32, #tpu.memory_space<vmem>>, %arg3: memref<32x64xbf16, #tpu.memory_space<vmem>>, %arg4: memref<1x64xf32, #tpu.memory_space<vmem>>, %arg5: memref<64x32xbf16, #tpu.memory_space<vmem>>, %arg6: memref<1x32xf32, #tpu.memory_space<vmem>>, %arg7: memref<1x32xf32, #tpu.memory_space<vmem>>, %arg8: memref<1x32xf32, #tpu.memory_space<vmem>>, %arg9: memref<1x8x32xf32, #tpu.memory_space<vmem>>) attributes {dimension_semantics = [#tpu.dimension_semantics<parallel>, #tpu.dimension_semantics<parallel>], iteration_bounds = array<i64: 2, 1>, scalar_prefetch = 0 : i64, scratch_operands = 0 : i64, tpu.core_type = #tpu.core_type<tc>, window_params = [{transform_indices = @transform_0, window_bounds = array<i64: 1, 8, 32>}, {pipeline_mode = #tpu.pipeline_mode<synchronous>, transform_indices = @transform_1, window_bounds = array<i64: 32, 64>}, {pipeline_mode = #tpu.pipeline_mode<synchronous>, transform_indices = @transform_2, window_bounds = array<i64: 1, 64>}, {pipeline_mode = #tpu.pipeline_mode<synchronous>, transform_indices = @transform_3, window_bounds = array<i64: 64, 32>}, {pipeline_mode = #tpu.pipeline_mode<synchronous>, transform_indices = @transform_4, window_bounds = array<i64: 1, 32>}, {pipeline_mode = #tpu.pipeline_mode<synchronous>, transform_indices = @transform_5, window_bounds = array<i64: 1, 32>}, {pipeline_mode = #tpu.pipeline_mode<synchronous>, transform_indices = @transform_6, window_bounds = array<i64: 1, 32>}, {transform_indices = @transform_7, window_bounds = array<i64: 1, 8, 32>}]} {
    %c0 = arith.constant 0 : index
    %c0_0 = arith.constant 0 : index
    %c0_1 = arith.constant 0 : index
    %0 = vector.load %arg2[%c0, %c0_0, %c0_1] : memref<1x8x32xf32, #tpu.memory_space<vmem>>, vector<1x8x32xf32>
    %1 = vector.shape_cast %0 : vector<1x8x32xf32> to vector<8x32xf32>
    %2 = arith.truncf %1 : vector<8x32xf32> to vector<8x32xbf16>
    %c0_2 = arith.constant 0 : index
    %c0_3 = arith.constant 0 : index
    %3 = vector.load %arg3[%c0_2, %c0_3] : memref<32x64xbf16, #tpu.memory_space<vmem>>, vector<32x64xbf16>
    %cst = arith.constant dense<0.000000e+00> : vector<8x64xf32>
    %4 = tpu.matmul %2, %3, %cst {dimension_numbers = #tpu.dot_dimension_numbers<[1], [0], [0], [1], [0, 0, 1, 1], [], []>} : vector<8x32xbf16>, vector<32x64xbf16>, vector<8x64xf32> -> vector<8x64xf32>
    %c0_4 = arith.constant 0 : index
    %c0_5 = arith.constant 0 : index
    %5 = vector.load %arg4[%c0_4, %c0_5] : memref<1x64xf32, #tpu.memory_space<vmem>>, vector<1x64xf32>
    %6 = vector.broadcast %5 : vector<1x64xf32> to vector<8x64xf32>
    %7 = arith.addf %4, %6 : vector<8x64xf32>
    %cst_6 = arith.constant 0.000000e+00 : f32
    %8 = vector.broadcast %cst_6 : f32 to vector<8x64xf32>
    %9 = arith.maximumf %7, %8 : vector<8x64xf32>
    %10 = arith.truncf %9 : vector<8x64xf32> to vector<8x64xbf16>
    %c0_7 = arith.constant 0 : index
    %c0_8 = arith.constant 0 : index
    %11 = vector.load %arg5[%c0_7, %c0_8] : memref<64x32xbf16, #tpu.memory_space<vmem>>, vector<64x32xbf16>
    %cst_9 = arith.constant dense<0.000000e+00> : vector<8x32xf32>
    %12 = tpu.matmul %10, %11, %cst_9 {dimension_numbers = #tpu.dot_dimension_numbers<[1], [0], [0], [1], [0, 0, 1, 1], [], []>} : vector<8x64xbf16>, vector<64x32xbf16>, vector<8x32xf32> -> vector<8x32xf32>
    %c0_10 = arith.constant 0 : index
    %c0_11 = arith.constant 0 : index
    %13 = vector.load %arg6[%c0_10, %c0_11] : memref<1x32xf32, #tpu.memory_space<vmem>>, vector<1x32xf32>
    %14 = vector.broadcast %13 : vector<1x32xf32> to vector<8x32xf32>
    %15 = arith.addf %12, %14 : vector<8x32xf32>
    %16 = arith.addf %15, %1 : vector<8x32xf32>
    %cst_12 = arith.constant dense<0.000000e+00> : vector<8xf32>
    %17 = vector.multi_reduction <add>, %16, %cst_12 [1] : vector<8x32xf32> to vector<8xf32>
    %18 = vector.shape_cast %17 : vector<8xf32> to vector<8x1xf32>
    %cst_13 = arith.constant 3.200000e+01 : f32
    %19 = vector.broadcast %cst_13 : f32 to vector<8x1xf32>
    %20 = arith.divf %18, %19 : vector<8x1xf32>
    %21 = vector.broadcast %20 : vector<8x1xf32> to vector<8x32xf32>
    %22 = arith.subf %16, %21 : vector<8x32xf32>
    %23 = arith.mulf %22, %22 : vector<8x32xf32>
    %cst_14 = arith.constant dense<0.000000e+00> : vector<8xf32>
    %24 = vector.multi_reduction <add>, %23, %cst_14 [1] : vector<8x32xf32> to vector<8xf32>
    %25 = vector.shape_cast %24 : vector<8xf32> to vector<8x1xf32>
    %cst_15 = arith.constant 3.200000e+01 : f32
    %26 = vector.broadcast %cst_15 : f32 to vector<8x1xf32>
    %27 = arith.divf %25, %26 : vector<8x1xf32>
    %28 = vector.broadcast %20 : vector<8x1xf32> to vector<8x32xf32>
    %29 = arith.subf %16, %28 : vector<8x32xf32>
    %cst_16 = arith.constant 9.99999974E-6 : f32
    %30 = vector.broadcast %cst_16 : f32 to vector<8x1xf32>
    %31 = arith.addf %27, %30 : vector<8x1xf32>
    %32 = math.rsqrt %31 : vector<8x1xf32>
    %33 = vector.broadcast %32 : vector<8x1xf32> to vector<8x32xf32>
    %34 = arith.mulf %29, %33 : vector<8x32xf32>
    %c0_17 = arith.constant 0 : index
    %c0_18 = arith.constant 0 : index
    %35 = vector.load %arg7[%c0_17, %c0_18] : memref<1x32xf32, #tpu.memory_space<vmem>>, vector<1x32xf32>
    %36 = vector.broadcast %35 : vector<1x32xf32> to vector<8x32xf32>
    %37 = arith.mulf %34, %36 : vector<8x32xf32>
    %c0_19 = arith.constant 0 : index
    %c0_20 = arith.constant 0 : index
    %38 = vector.load %arg8[%c0_19, %c0_20] : memref<1x32xf32, #tpu.memory_space<vmem>>, vector<1x32xf32>
    %39 = vector.broadcast %38 : vector<1x32xf32> to vector<8x32xf32>
    %40 = arith.addf %37, %39 : vector<8x32xf32>
    %c0_21 = arith.constant 0 : index
    %c0_22 = arith.constant 0 : index
    %c0_23 = arith.constant 0 : index
    %41 = vector.load %arg9[%c0_21, %c0_22, %c0_23] : memref<1x8x32xf32, #tpu.memory_space<vmem>>, vector<1x8x32xf32>
    %42 = vector.shape_cast %41 : vector<1x8x32xf32> to vector<8x32xf32>
    %43 = vector.shape_cast %40 : vector<8x32xf32> to vector<1x8x32xf32>
    tpu.vector_store %arg9[%c0_21, %c0_22, %c0_23], %43 {strides = array<i32>} : memref<1x8x32xf32, #tpu.memory_space<vmem>>, vector<1x8x32xf32>,
    return
  }
  func.func @transform_0(%arg0: i32, %arg1: i32) -> (i32, i32, i32) {
    %c0_i32 = arith.constant 0 : i32
    %c0_i32_0 = arith.constant 0 : i32
    return %arg0, %arg1, %c0_i32 : i32, i32, i32
  }
  func.func @transform_1(%arg0: i32, %arg1: i32) -> (i32, i32) {
    %c0_i32 = arith.constant 0 : i32
    %c0_i32_0 = arith.constant 0 : i32
    %c0_i32_1 = arith.constant 0 : i32
    return %c0_i32, %c0_i32_0 : i32, i32
  }
  func.func @transform_2(%arg0: i32, %arg1: i32) -> (i32, i32) {
    %c0_i32 = arith.constant 0 : i32
    %c0_i32_0 = arith.constant 0 : i32
    %c0_i32_1 = arith.constant 0 : i32
    return %c0_i32, %c0_i32_0 : i32, i32
  }
  func.func @transform_3(%arg0: i32, %arg1: i32) -> (i32, i32) {
    %c0_i32 = arith.constant 0 : i32
    %c0_i32_0 = arith.constant 0 : i32
    %c0_i32_1 = arith.constant 0 : i32
    return %c0_i32, %c0_i32_0 : i32, i32
  }
  func.func @transform_4(%arg0: i32, %arg1: i32) -> (i32, i32) {
    %c0_i32 = arith.constant 0 : i32
    %c0_i32_0 = arith.constant 0 : i32
    %c0_i32_1 = arith.constant 0 : i32
    return %c0_i32, %c0_i32_0 : i32, i32
  }
  func.func @transform_5(%arg0: i32, %arg1: i32) -> (i32, i32) {
    %c0_i32 = arith.constant 0 : i32
    %c0_i32_0 = arith.constant 0 : i32
    %c0_i32_1 = arith.constant 0 : i32
    return %c0_i32, %c0_i32_0 : i32, i32
  }
  func.func @transform_6(%arg0: i32, %arg1: i32) -> (i32, i32) {
    %c0_i32 = arith.constant 0 : i32
    %c0_i32_0 = arith.constant 0 : i32
    %c0_i32_1 = arith.constant 0 : i32
    return %c0_i32, %c0_i32_0 : i32, i32
  }
  func.func @transform_7(%arg0: i32, %arg1: i32) -> (i32, i32, i32) {
    %c0_i32 = arith.constant 0 : i32
    %c0_i32_0 = arith.constant 0 : i32
    return %arg0, %arg1, %c0_i32 : i32, i32, i32
  }
}

</mosaic_0001>

<bundles_post_ra>
// kernel: transformer_decoder.11
= control target key start
LH: loop header
LB: loop body
LE: loop exit
PB: predicated region body
PF: predicated region fallthrough
CT: control target
= control target key end

     0   :  { %12 = vsyncpa [#allocation3], 0  ;;  %s957_s0 = inlined_call_operand.vmem [shape: f32[2,8,32], index: 0, kind: input, shape index: {}]   ;;  %s958_s1 = inlined_call_operand.vmem [shape: bf16[32,64], index: 1, kind: input, shape index: {}]   ;;  %s959_s2 = inlined_call_operand.vmem [shape: f32[1,64], index: 2, kind: input, shape index: {}]   ;;  %s960_s3 = inlined_call_operand.vmem [shape: bf16[64,32], index: 3, kind: input, shape index: {}]   ;;  %s961_s4 = inlined_call_operand.vmem [shape: f32[1,32], index: 4, kind: input, shape index: {}]   ;;  %s962_s5 = inlined_call_operand.vmem [shape: f32[1,32], index: 5, kind: input, shape index: {}]   ;;  %s963_s6 = inlined_call_operand.vmem [shape: f32[1,32], index: 6, kind: input, shape index: {}]   ;;  %s964_s7 = inlined_call_operand.hbm [shape: f32[2,8,32], index: 7, kind: output, shape index: {}]  }
   0x1   :  { %14 = vsyncpa [#allocation3 + $0x1], 0  ;;  %s811_s24 = smov 0   ;;  %s813_s25 = smov 0  }
   0x2   :  { %s815_s26 = smov 0   ;;  %s817_s27 = smov 0  }
   0x3   :  { %s819_s28 = smov 0   ;;  %s821_s29 = smov 0  }
   0x4 LB: > { %s572_s30 = sadd.s32 4294967295, %s766_s29   ;;  %s573_s8 = sadd.s32 4294967294, %s766_s29   ;;  %s766_s29 = sphi %s821_s29, %s20_s29   ;;  %s762_s28 = sphi %s819_s28, %s971_s28   ;;  %s758_s27 = sphi %s817_s27, %s970_s27   ;;  %s754_s26 = sphi %s815_s26, %s969_s26   ;;  %s750_s25 = sphi %s813_s25, %s968_s25   ;;  %s746_s24 = sphi %s811_s24, %s967_s24  }
   0x5   : > { %s32_s9 = sadd.s32 1, %s762_s28  ;;  %s195_s10 = sadd.s32 1, %s754_s26 }
   0x6   : > { %p34_p0 = scmp.ge.s32.totalorder %s32_s9, 2  ;;  %p205_p1 = scmp.ne.s32.totalorder %s754_s26, %s750_s25 }
   0x7   : > { %p206_p2 = scmp.eq.s32.totalorder %s572_s30, 1  ;;  %p211_p3 = scmp.ne.s32.totalorder %s750_s25, %s746_s24 }
   0x8   : > { %s973_s9 = smov (%p34_p0, %s32_s9), 0  ;;  %p212_p5 = scmp.eq.s32.totalorder %s573_s8, 1 }
   0x9   : > { %p851_p4 = por %p206_p2, %p205_p1  ;;  %s190_s12 = ssub.s32 %s762_s28, %s973_s9 }
   0xa   : > { %p576_p6 = scmp.ge.s32.totalorder %s766_s29, 1  ;;  %p193_p7 = scmp.eq.s32.totalorder %s190_s12, 0 }
   0xb   : > { %p858_p8 = por %p212_p5, %p211_p3  ;;  %p258_p9 = scmp.lt.s32.totalorder %s766_s29, 3 }
   0xc   : > { %s864_s14 = scalar_select %p193_p7, %s754_s26, %s195_s10  }
   0xd   : > { %p259_p10 = pnand %p576_p6, %p258_p9 }
   0xe   : > { %v680_v0 = vld [vmem:[%s958_s1] sm:$0xff] (!%p259_p10)   ;;  %v768_v1 = vmov (!%p259_p10), 0.0   ;;  %v681_v2 = vld [vmem:[%s958_s1 + $0x8] sm:$0xff] (!%p259_p10)   ;;  %vm769_vm0 = vmmov (!%p259_p10), 0   ;;  %p292_p11 = scmp.lt.s32.totalorder (!%p259_p10), %s758_s27, 1  ;;  %vm325_vm1 = vcmask (!%p259_p10), 261120  }
   0xf   : > { %262 = sbr.rel (%p259_p10) target bundleno = 790 (0x316), region = 48  ;;  %603 = vmatprep.subr.bf16.mxu0 (!%p259_p10), %v768_v1  ;;  %611 = vmatprep.subr.bf16.mxu1 (!%p259_p10), %v768_v1  ;;  %v682_v3 = vld [vmem:[%s960_s3] sm:$0xff] (!%p259_p10)   ;;  %v683_v4 = vld [vmem:[%s960_s3 + $0x8] sm:$0xff] (!%p259_p10)   ;;  %v684_v7 = vld [vmem:[%s960_s3 + $0x10] sm:$0xff] (!%p259_p10)   ;;  %vm410_vm2 = vcmask (!%p259_p10), 523264   ;;  %s289_s23 = sand.u32 (!%p259_p10), 1, %s750_s25  }
  0x10   : > { %604 = vmatpush3.bf16.msra.mxu0 (!%p259_p10), %v680_v0  ;;  %607 = vmatprep.mubr.msk.bf16.mxu0 (!%p259_p10), %vm769_vm0, %v768_v1  ;;  %v685_v8 = vld [vmem:[%s960_s3 + $0x18] sm:$0xff] (!%p259_p10)   ;;  %v579_v9 = vld [vmem:[%s959_s2] ss:$0 sm:$0xff] (!%p259_p10)  ;;  %s592_s16 = sshll.u32 (!%p259_p10), %s758_s27, 7  ;;  %s487_s22 = scalar_lea.sflag (!%p259_p10), [#allocation3], %s289_s23 }
  0x11   : > { %605 = vmatprep.subr.bf16.mxu0 (!%p259_p10), %v768_v1  ;;  %619 = vmatprep.mubr.msk.bf16.mxu1 (!%p259_p10), %vm769_vm0, %v768_v1  ;;  %v583_v17 = vld [vmem:[%s961_s4] ss:$0 sm:$0xff] (!%p259_p10) }
  0x12   : > { %612 = vmatpush3.bf16.msra.mxu1 (!%p259_p10), %v682_v3  ;;  %v589_v34 = vld [vmem:[%s962_s5] ss:$0 sm:$0xff] (!%p259_p10) }
  0x13   : > { %613 = vmatprep.subr.bf16.mxu1 (!%p259_p10), %v768_v1  ;;  %v590_v36 = vld [vmem:[%s963_s6] ss:$0 sm:$0xff] (!%p259_p10) }
  0x14   : > { %606 = vmatpush3.bf16.msra.mxu0 (!%p259_p10), %v681_v2 }
  0x16   : > { %s293_s21 = scalar_select %p292_p11, %s758_s27, 1  ;;  %614 = vmatpush3.bf16.msra.mxu1 %v683_v4 }
  0x17   : > { %615 = vmatprep.subr.bf16.mxu1 %v768_v1  ;;  %s770_s27 = smov [#allocation2]  }
  0x18   : > { %s578_s30 = sshll.u32 %s293_s21, 3  ;;  %s909_s21 = scalar_lea.hbm %s964_s7, %s592_s16 }
  0x19   : > { %s298_s12 = scalar_lea.vmem %s957_s0, %s578_s30  ;;  %s577_s30 = sshll.u32 %s289_s23, 3 }
  0x1a   : > { %v300_v5 = vld [vmem:[%s298_s12] sm:$0xff]  ;;  %616 = vmatpush3.bf16.msra.mxu1 %v684_v7  ;;  %s291_s17 = scalar_lea.vmem [#allocation2], %s577_s30  ;;  %s692_s30 = sshll.u32 %s770_s27, 4  ;;  %s693_s30 = int_to_ptr.vmem [resolvable:$false] %s692_s30 }
  0x1b   : > { %v301_v6 = vpack.c.bf16 %v300_v5, %v300_v5  ;;  %617 = vmatprep.subr.bf16.mxu1 %v768_v1  ;;  %s501_s18 = sshll.u32 %s291_s17, 4  ;;  %s694_s10 = scalar_lea.vmem %s693_s30, 256  ;;  %s911_s18 = int_to_ptr.vmem [resolvable:$true] %s501_s18 }
  0x1c   : > { %s688_s8 = scalar_lea.vmem %s911_s18, 128  ;;  %p695_p1 = scmp.lt.s32.totalorder %s911_s18, %s693_s30 }
  0x1d   : > { %608 = vmatmul.mubr.msk.bf16.vlgmr.msra.gmra.mrb[0].mxu0 %vm325_vm1, %v301_v6  ;;  %p689_p12 = scmp.ne.s32.totalorder %s911_s18, %s688_s8  ;;  %p696_p2 = scmp.lt.s32.totalorder %s694_s10, %s688_s8 }
  0x1e   : > { %618 = vmatpush3.bf16.msra.mxu1 %v685_v8 }
  0x1f   : > { %p690_p13 = pnand %p689_p12, %p851_p4  ;;  %p697_p3 = por %p696_p2, %p695_p1 }
  0x21   : > { %p691_p0 = pneg %p690_p13 }
  0x23   : > { %p698_p5 = pnand %p697_p3, %p691_p0 }
  0xf0   : > { %v363_v10 = vpop.f32.mrb[0].mxu0 }
  0xf1   : > { %v364_v11 = vadd.f32 %v579_v9, %v363_v10  ;;  %v609_v12 = vpop.f32.mrb[1].mxu0 }
  0xf2   : > { %v366_v13 = vpop.f32.mrb[2].mxu0 }
  0xf3   : > { %v369_v14 = vmax.f32 %v364_v11, 0.0  ;;  %v610_v15 = vpop.f32.mrb[3].mxu0 }
  0xf5   : > { %v370_v16 = vpack.c.bf16 %v369_v14, %v369_v14 }
  0xf7   : > { %620 = vmatmul.mubr.msk.bf16.vlgmr.msra.gmra.mrb[0].mxu1 %vm410_vm2, %v370_v16 }
 0x1ca   : > { %v448_v18 = vpop.f32.mrb[0].mxu1 }
 0x1cb   : > { %v449_v19 = vadd.f32 %v583_v17, %v448_v18  ;;  %v621_v20 = vpop.f32.mrb[1].mxu1 }
 0x1cc   : > { %v451_v21 = vpop.f32.mrb[2].mxu1 }
 0x1cd   : > { %v622_v22 = vpop.f32.mrb[3].mxu1  ;;  %v454_v23 = vadd.f32 %v449_v19, %v300_v5 }
 0x1cf   : > { %v455_v24 = vsel %vm325_vm1, %v454_v23, 0.0 }
 0x1d0   : > { %456 = vadd.xlane.f32.xlu0 %v455_v24 }
 0x25d   : > { %v457_v25 = vpop.xlane.xlu0 %456 }
 0x25e   : > { %v459_v26 = vmul.f32 0.03125, %v457_v25 }
 0x260   : > { %v460_v27 = vsub.f32 %v454_v23, %v459_v26 }
 0x262   : > { %v461_v28 = vmul.f32 %v460_v27, %v460_v27 }
 0x264   : > { %v462_v29 = vsel %vm325_vm1, %v461_v28, 0.0 }
 0x265   : > { %463 = vadd.xlane.f32.xlu0 %v462_v29 }
 0x2f2   : > { %v464_v30 = vpop.xlane.xlu0 %463 }
 0x2f3   : > { %v465_v31 = vmul.f32 0.03125, %v464_v30 }
 0x2f5   : > { %v466_v32 = vadd.f32 1e-05, %v465_v31 }
 0x2f7   : > { %686 = vrsqrt.f32 %v466_v32 }
 0x301   : > { %v687_v33 = vpop.eup %686 }
 0x302   : > { %v468_v35 = vmul.f32 %v687_v33, %v460_v27 }
 0x304   : > { %v476_v37 = vmul.f32 %v589_v34, %v468_v35 }
 0x306   : > { %v484_v38 = vadd.f32 %v590_v36, %v476_v37 }
 0x308   : > { %485 = vst.msk [vmem:[%s291_s17] sm:$0xff] %vm325_vm1, %v484_v38 }
 0x309   : > { %701 = shalt.err (!%p698_p5)
}
 0x30a   : > { %s702_s23 = scalar_lea.hbm %s909_s21, 128  ;;  %s706_s16 = scalar_lea.hbm %s964_s7, 256 }
 0x30b   : > { %p703_p6 = scmp.ne.s32.totalorder %s909_s21, %s702_s23  ;;  %p707_p10 = scmp.lt.u32.totalorder %s909_s21, %s964_s7 }
 0x30c   : > { %p708_p11 = scmp.lt.u32.totalorder %s706_s16, %s702_s23  ;;  %p710_p13 = scmp.lt.u32.totalorder %s702_s23, %s909_s21 }
 0x30d   : > { %p704_p7 = pnand %p703_p6, %p851_p4 }
 0x30e   : > { %p709_p12 = por %p708_p11, %p707_p10 }
 0x30f   : > { %p705_p9 = pneg %p704_p7 }
 0x310   : > { %p711_p0 = por %p710_p13, %p709_p12 }
 0x312   : > { %p712_p1 = pnand %p711_p0, %p705_p9 }
 0x314   : > { %715 = shalt.err (!%p712_p1)
}
 0x315   : > { %623 = dma.vmem_to_hbm [thread:$0]  (%p851_p4), %s911_s18, 128, %s909_s21, %s487_s22  }
 0x316 PF: > { %p629_p2 = scmp.ge.s32.totalorder %s766_s29, 2  ;;  %s513_s20 = sand.u32 1, %s746_s24  }
 0x317   : > { %s514_s8 = scalar_lea.sflag [#allocation3], %s513_s20 }
 0x318   : > { %p626_p3 = pnand %p629_p2, %p858_p8 }
 0x31a   : > { %741 = dma.done.wait (!%p626_p3), %s514_s8, 128  }
 0x31b   : > { %743 = vsyncadd (!%p626_p3), %s514_s8, 4294967168  ;;  %s20_s29 = sadd.s32 1, %s766_s29   ;;  %s967_s24 = smov %s750_s25 }
 0x31c   : > { %p17_p5 = scmp.ge.s32.totalorder %s20_s29, 4   ;;  %s968_s25 = smov %s754_s26 }
 0x31d   : > { %s969_s26 = smov %s864_s14  ;;  %s970_s27 = smov %s762_s28 }
 0x31e   : > { %s971_s28 = smov %s973_s9  ;;  %19 = sbr.rel (!%p17_p5) target bundleno = 4 (0x4), region = 83 }
 0x325   :  { %519 = vsyncpa [#allocation3], 1 }
 0x326   :  { %521 = vsyncpa [#allocation3 + $0x1], 1 }

// kernel: transformer_decoder.8
= control target key start
LH: loop header
LB: loop body
LE: loop exit
PB: predicated region body
PF: predicated region fallthrough
CT: control target
= control target key end

     0   :  { %s715_s24 = smov 0   ;;  %s717_s25 = smov 0   ;;  %s789_s0 = inlined_call_operand.vmem [shape: f32[2,8,32], index: 0, kind: input, shape index: {}]   ;;  %s790_s1 = inlined_call_operand.vmem [shape: bf16[32,64], index: 1, kind: input, shape index: {}]   ;;  %s791_s2 = inlined_call_operand.vmem [shape: f32[1,64], index: 2, kind: input, shape index: {}]   ;;  %s792_s3 = inlined_call_operand.vmem [shape: bf16[64,32], index: 3, kind: input, shape index: {}]   ;;  %s793_s4 = inlined_call_operand.vmem [shape: f32[1,32], index: 4, kind: input, shape index: {}]   ;;  %s794_s5 = inlined_call_operand.vmem [shape: f32[1,32], index: 5, kind: input, shape index: {}]   ;;  %s795_s6 = inlined_call_operand.vmem [shape: f32[1,32], index: 6, kind: input, shape index: {}]   ;;  %s796_s7 = inlined_call_operand.vmem [shape: f32[2,8,32], index: 7, kind: output, shape index: {}]  }
   0x1   :  { %s719_s26 = smov 0  }
   0x2 LB: > { %s29_s27 = sadd.s32 1, %s667_s25  ;;  %p570_p0 = scmp.ge.s32.totalorder %s671_s26, 1  ;;  %s671_s26 = sphi %s719_s26, %s17_s26   ;;  %s667_s25 = sphi %s717_s25, %s798_s25   ;;  %s663_s24 = sphi %s715_s24, %s797_s24  }
   0x3   : > { %p31_p1 = scmp.ge.s32.totalorder %s29_s27, 2  ;;  %p255_p2 = scmp.lt.s32.totalorder %s671_s26, 3 }
   0x5   : > { %s800_s27 = smov (%p31_p1, %s29_s27), 0  ;;  %p256_p3 = pnand %p570_p0, %p255_p2 }
   0x6   : > { %v641_v0 = vld [vmem:[%s790_s1] sm:$0xff] (!%p256_p3)   ;;  %v673_v1 = vmov (!%p256_p3), 0.0   ;;  %v642_v2 = vld [vmem:[%s790_s1 + $0x8] sm:$0xff] (!%p256_p3)   ;;  %vm674_vm0 = vmmov (!%p256_p3), 0   ;;  %p291_p4 = scmp.lt.s32.totalorder (!%p256_p3), %s663_s24, 1  ;;  %vm331_vm1 = vcmask (!%p256_p3), 261120  }
   0x7   : > { %259 = sbr.rel (%p256_p3) target bundleno = 768 (0x300), region = 48  ;;  %595 = vmatprep.subr.bf16.mxu0 (!%p256_p3), %v673_v1  ;;  %603 = vmatprep.subr.bf16.mxu1 (!%p256_p3), %v673_v1  ;;  %v643_v3 = vld [vmem:[%s792_s3] sm:$0xff] (!%p256_p3)   ;;  %v644_v4 = vld [vmem:[%s792_s3 + $0x8] sm:$0xff] (!%p256_p3)   ;;  %v645_v7 = vld [vmem:[%s792_s3 + $0x10] sm:$0xff] (!%p256_p3)   ;;  %vm416_vm2 = vcmask (!%p256_p3), 523264  }
   0x8   : > { %596 = vmatpush3.bf16.msra.mxu0 (!%p256_p3), %v641_v0  ;;  %599 = vmatprep.mubr.msk.bf16.mxu0 (!%p256_p3), %vm674_vm0, %v673_v1  ;;  %v646_v8 = vld [vmem:[%s792_s3 + $0x18] sm:$0xff] (!%p256_p3)   ;;  %v573_v9 = vld [vmem:[%s791_s2] ss:$0 sm:$0xff] (!%p256_p3) }
   0x9   : > { %597 = vmatprep.subr.bf16.mxu0 (!%p256_p3), %v673_v1  ;;  %611 = vmatprep.mubr.msk.bf16.mxu1 (!%p256_p3), %vm674_vm0, %v673_v1  ;;  %v577_v17 = vld [vmem:[%s793_s4] ss:$0 sm:$0xff] (!%p256_p3) }
   0xa   : > { %604 = vmatpush3.bf16.msra.mxu1 (!%p256_p3), %v643_v3  ;;  %v583_v34 = vld [vmem:[%s794_s5] ss:$0 sm:$0xff] (!%p256_p3) }
   0xb   : > { %605 = vmatprep.subr.bf16.mxu1 (!%p256_p3), %v673_v1  ;;  %v584_v36 = vld [vmem:[%s795_s6] ss:$0 sm:$0xff] (!%p256_p3) }
   0xc   : > { %598 = vmatpush3.bf16.msra.mxu0 (!%p256_p3), %v642_v2 }
   0xe   : > { %s802_s24 = smov (!%p291_p4, %s663_s24), 1  ;;  %606 = vmatpush3.bf16.msra.mxu1 %v644_v4 }
   0xf   : > { %s571_s13 = sshll.u32 %s802_s24, 3  ;;  %607 = vmatprep.subr.bf16.mxu1 %v673_v1 }
  0x10   : > { %s297_s16 = scalar_lea.vmem %s789_s0, %s571_s13  ;;  %s304_s12 = scalar_lea.vmem %s796_s7, %s571_s13 }
  0x11   : > { %v306_v5 = vld [vmem:[%s297_s16] sm:$0xff] }
  0x12   : > { %v307_v6 = vpack.c.bf16 %v306_v5, %v306_v5  ;;  %608 = vmatpush3.bf16.msra.mxu1 %v645_v7 }
  0x13   : > { %609 = vmatprep.subr.bf16.mxu1 %v673_v1 }
  0x14   : > { %600 = vmatmul.mubr.msk.bf16.vlgmr.msra.gmra.mrb[0].mxu0 %vm331_vm1, %v307_v6 }
  0x16   : > { %610 = vmatpush3.bf16.msra.mxu1 %v646_v8 }
  0xe7   : > { %v369_v10 = vpop.f32.mrb[0].mxu0 }
  0xe8   : > { %v370_v11 = vadd.f32 %v573_v9, %v369_v10  ;;  %v601_v12 = vpop.f32.mrb[1].mxu0 }
  0xe9   : > { %v372_v13 = vpop.f32.mrb[2].mxu0 }
  0xea   : > { %v375_v14 = vmax.f32 %v370_v11, 0.0  ;;  %v602_v15 = vpop.f32.mrb[3].mxu0 }
  0xec   : > { %v376_v16 = vpack.c.bf16 %v375_v14, %v375_v14 }
  0xee   : > { %612 = vmatmul.mubr.msk.bf16.vlgmr.msra.gmra.mrb[0].mxu1 %vm416_vm2, %v376_v16 }
 0x1c1   : > { %v454_v18 = vpop.f32.mrb[0].mxu1 }
 0x1c2   : > { %v455_v19 = vadd.f32 %v577_v17, %v454_v18  ;;  %v613_v20 = vpop.f32.mrb[1].mxu1 }
 0x1c3   : > { %v457_v21 = vpop.f32.mrb[2].mxu1 }
 0x1c4   : > { %v614_v22 = vpop.f32.mrb[3].mxu1  ;;  %v460_v23 = vadd.f32 %v455_v19, %v306_v5 }
 0x1c6   : > { %v461_v24 = vsel %vm331_vm1, %v460_v23, 0.0 }
 0x1c7   : > { %462 = vadd.xlane.f32.xlu0 %v461_v24 }
 0x254   : > { %v463_v25 = vpop.xlane.xlu0 %462 }
 0x255   : > { %v465_v26 = vmul.f32 0.03125, %v463_v25 }
 0x257   : > { %v466_v27 = vsub.f32 %v460_v23, %v465_v26 }
 0x259   : > { %v467_v28 = vmul.f32 %v466_v27, %v466_v27 }
 0x25b   : > { %v468_v29 = vsel %vm331_vm1, %v467_v28, 0.0 }
 0x25c   : > { %469 = vadd.xlane.f32.xlu0 %v468_v29 }
 0x2e9   : > { %v470_v30 = vpop.xlane.xlu0 %469 }
 0x2ea   : > { %v471_v31 = vmul.f32 0.03125, %v470_v30 }
 0x2ec   : > { %v472_v32 = vadd.f32 1e-05, %v471_v31 }
 0x2ee   : > { %647 = vrsqrt.f32 %v472_v32 }
 0x2f8   : > { %v648_v33 = vpop.eup %647 }
 0x2f9   : > { %v474_v35 = vmul.f32 %v648_v33, %v466_v27 }
 0x2fb   : > { %v482_v37 = vmul.f32 %v583_v34, %v474_v35 }
 0x2fd   : > { %v490_v38 = vadd.f32 %v584_v36, %v482_v37 }
 0x2ff   : > { %491 = vst.msk [vmem:[%s304_s12] sm:$0xff] %vm331_vm1, %v490_v38 }
 0x300 PF: > { %s17_s26 = sadd.s32 1, %s671_s26   ;;  %s797_s24 = smov %s667_s25 }
 0x301   : > { %p14_p5 = scmp.ge.s32.totalorder %s17_s26, 4   ;;  %s798_s25 = smov %s800_s27 }
 0x303   :  { %16 = sbr.rel (!%p14_p5) target bundleno = 2 (0x2), region = 78 }

// kernel: transformer_decoder.6
= control target key start
LH: loop header
LB: loop body
LE: loop exit
PB: predicated region body
PF: predicated region fallthrough
CT: control target
= control target key end

     0   :  { %s1490_s25 = smov 0   ;;  %s1492_s26 = smov 0   ;;  %s1651_s0 = inlined_call_operand.vmem [shape: f32[2,8,32], index: 0, kind: input, shape index: {}, may-alias: {0,1}]   ;;  %s1652_s1 = inlined_call_operand.vmem [shape: f32[2,8,32], index: 1, kind: input, shape index: {}, may-alias: {0,1}]   ;;  %s1653_s2 = inlined_call_operand.vmem [shape: f32[8,8], index: 2, kind: input, shape index: {}]   ;;  %s1654_s3 = inlined_call_operand.vmem [shape: bf16[4,32,8], index: 3, kind: input, shape index: {}]   ;;  %s1655_s4 = inlined_call_operand.vmem [shape: f32[4,1,8], index: 4, kind: input, shape index: {}]   ;;  %s1656_s5 = inlined_call_operand.vmem [shape: bf16[4,32,8], index: 5, kind: input, shape index: {}]   ;;  %s1657_s6 = inlined_call_operand.vmem [shape: f32[4,1,8], index: 6, kind: input, shape index: {}]   ;;  %s1658_s7 = inlined_call_operand.vmem [shape: bf16[4,32,8], index: 7, kind: input, shape index: {}]   ;;  %s1659_s8 = inlined_call_operand.vmem [shape: f32[4,1,8], index: 8, kind: input, shape index: {}]   ;;  %s1660_s9 = inlined_call_operand.vmem [shape: bf16[4,8,32], index: 9, kind: input, shape index: {}]   ;;  %s1661_s10 = inlined_call_operand.vmem [shape: f32[1,32], index: 10, kind: input, shape index: {}]   ;;  %s1662_s11 = inlined_call_operand.vmem [shape: f32[1,32], index: 11, kind: input, shape index: {}]   ;;  %s1663_s12 = inlined_call_operand.vmem [shape: f32[1,32], index: 12, kind: input, shape index: {}]   ;;  %s1664_s13 = inlined_call_operand.vmem [shape: f32[2,8,32], index: 13, kind: output, shape index: {}]  }
   0x1   :  { %1668 = sst [smem:[#allocation8_spill]] %s1652_s1  ;;  %s1494_s27 = smov 0  }
   0x2   :  { %1669 = sst [smem:[#allocation9_spill]] %s1654_s3  ;;  %s1496_s28 = smov 0  }
   0x3   :  { %1670 = sst [smem:[#allocation10_spill]] %s1661_s10  ;;  %s1498_s29 = smov 0  }
   0x4   :  { %1671 = sst [smem:[#allocation11_spill]] %s1662_s11 }
   0x5   :  { %1672 = sst [smem:[#allocation12_spill]] %s1663_s12 }
   0x6 LB: > { %1673 = sst [smem:[#allocation3_spill]] %s1407_s27  ;;  %s35_s30 = sadd.s32 1, %s1407_s27  ;;  %s1415_s29 = sphi %s1498_s29, %s23_s29   ;;  %s1411_s28 = sphi %s1496_s28, %s1689_s28   ;;  %s1407_s27 = sphi %s1494_s27, %s1688_s27   ;;  %s1403_s26 = sphi %s1492_s26, %s1687_s26   ;;  %s1399_s25 = sphi %s1490_s25, %s1686_s25  }
   0x7   : > { %1674 = sst [smem:[#allocation4_spill]] %s1411_s28  ;;  %s42_s14 = sadd.s32 1, %s1411_s28 }
   0x8   : > { %1675 = sst [smem:[#allocation5_spill]] %s1415_s29  ;;  %p36_p0 = scmp.ge.s32.totalorder %s35_s30, 4 }
   0x9   : > { %p1229_p1 = scmp.ge.s32.totalorder %s1415_s29, 1  ;;  %p493_p2 = scmp.lt.s32.totalorder %s1415_s29, 9 }
   0xa   : > { %s1691_s30 = smov (%p36_p0, %s35_s30), 0  ;;  %s1693_s14 = smov (!%p36_p0, %s42_s14), %s1411_s28 }
   0xb   : > { %1676 = sst [smem:[#allocation6_spill]] %s1691_s30  ;;  %p494_p3 = pnand %p1229_p1, %p493_p2 }
   0xc   : > { %p44_p4 = scmp.ge.s32.totalorder %s1693_s14, 2  ;;  %p577_p5 = scmp.lt.s32.totalorder (!%p494_p3), %s1403_s26, 1 }
   0xd   : > { %497 = sbr.rel (%p494_p3) target bundleno = 1546 (0x60a), region = 72  ;;  %p592_p6 = scmp.lt.s32.totalorder (!%p494_p3), %s1399_s25, 3 }
   0xe   : > { %s1695_s14 = smov (%p44_p4, %s1693_s14), 0  ;;  %s1678_s1 = sld [smem:[#allocation8_spill]] (!%p494_p3) }
   0xf   : > { %1677 = sst [smem:[#allocation7_spill]] %s1695_s14  ;;  %s1679_s3 = sld [smem:[#allocation9_spill]] (!%p494_p3) }
  0x10   : > { %p1240_p7 = scmp.ne.s32.totalorder (!%p494_p3), %s1399_s25, 0 }
  0x14   : > { %s1697_s26 = smov (!%p577_p5, %s1403_s26), 1  ;;  %vm632_vm0 = vcmask (!%p1240_p7), 261120   ;;  %v1417_v0 = vmov (!%p1240_p7), 0.0  }
  0x15   : > { %s1524_s15 = scalar_select %p592_p6, %s1399_s25, 3 }
  0x16   : > { %s1526_s16 = sshll.u32 %s1697_s26, 3  ;;  %631 = sbr.rel (%p1240_p7) target bundleno = 29 (0x1d), region = 76  ;;  %633 = vst.msk [vmem:[#allocation2] sm:$0xff] (!%p1240_p7), %vm632_vm0, %v1417_v0 }
  0x17   : > { %s587_s22 = scalar_lea.vmem %s1678_s1, %s1526_s16  ;;  %s1262_s23 = sshll.u32 %s1524_s15, 4 }
  0x18   : > { %s596_s26 = scalar_lea.vmem %s1679_s3, %s1262_s23  ;;  %s604_s17 = scalar_lea.vmem %s1656_s5, %s1262_s23 }
  0x19   : > { %s607_s19 = scalar_lea.vmem %s1657_s6, %s1524_s15  ;;  %s1554_s21 = scalar_lea.vmem %s1658_s7, %s1262_s23 }
  0x1a   : > { %s615_s24 = scalar_lea.vmem %s1659_s8, %s1524_s15  ;;  %s1238_s30 = sshll.u32 %s1524_s15, 2 }
  0x1b   : > { %s1564_s3 = scalar_lea.vmem %s1660_s9, %s1238_s30  ;;  %s626_s11 = scalar_lea.vmem %s1664_s13, %s1526_s16 }
  0x1d PF: > { %v1365_v1 = vld [vmem:[%s604_s17] sm:$0xff]   ;;  %v1418_v2 = vmov 0.0   ;;  %v1367_v4 = vld [vmem:[%s604_s17 + $0x8] sm:$0xff]   ;;  %vm1419_vm1 = vmmov 0   ;;  %s1680_s30 = scalar_lea.vmem %s1651_s0, %s1526_s16  ;;  %vm661_vm2 = vcmask 261120   ;;  %s1681_s18 = scalar_lea.vmem %s1655_s4, %s1524_s15  ;;  %vm838_vm3 = vcmask 64512  }
  0x1e   : > { %1288 = vmatprep.subr.bf16.mxu1 %v1418_v2  ;;  %1280 = vmatprep.subr.bf16.mxu0 %v1418_v2  ;;  %v1366_v3 = vld [vmem:[%s596_s26] sm:$0xff]   ;;  %v1368_v6 = vld [vmem:[%s596_s26 + $0x8] sm:$0xff]   ;;  %vm901_vm4 = vcmask 1043456   ;;  %p1256_p8 = scmp.ne.s32.totalorder %s1399_s25, 3 }
  0x1f   : > { %1289 = vmatpush3.bf16.msra.mxu1 %v1365_v1  ;;  %1292 = vmatprep.mubr.msk.bf16.mxu1 %vm1419_vm1, %v1418_v2  ;;  %v635_v5 = vld [vmem:[%s587_s22] sm:$0xff]  ;;  %v1370_v27 = vld [vmem:[%s1554_s21 + $0x8] sm:$0xff]   ;;  %s1683_s28 = sld [smem:[#allocation11_spill]] (!%p1256_p8)  ;;  %s1684_s1 = sld [smem:[#allocation12_spill]] (!%p1256_p8) }
  0x20   : > { %1290 = vmatprep.subr.bf16.mxu1 %v1418_v2  ;;  %1281 = vmatpush3.bf16.msra.mxu0 %v1366_v3  ;;  %v1578_v7 = vld [vmem:[%s1680_s30] sm:$0xff]  ;;  %v637_v8 = vpack.c.bf16 %v635_v5, %v635_v5 }
  0x21   : > { %1282 = vmatprep.subr.bf16.mxu0 %v1418_v2  ;;  %1284 = vmatprep.mubr.msk.bf16.mxu0 %vm1419_vm1, %v1418_v2  ;;  %v636_v9 = vpack.c.bf16 %v1578_v7, %v1578_v7  ;;  %v1245_v10 = vld [vmem:[%s607_s19] ss:$0 sm:$0xff] }
  0x22   : > { %v1241_v11 = vld [vmem:[%s1681_s18] ss:$0 sm:$0xff] }
  0x23   : > { %1291 = vmatpush3.bf16.msra.mxu1 %v1367_v4  ;;  %v1369_v26 = vld [vmem:[%s1554_s21] sm:$0xff]  }
  0x24   : > { %1283 = vmatpush3.bf16.msra.mxu0 %v1368_v6  ;;  %1304 = vmatprep.subr.bf16.mxu1 %v1418_v2  ;;  %v837_v28 = vld [vmem:[%s1653_s2] sm:$0xff] }
  0x25   : > { %1296 = vmatprep.subr.bf16.mxu0 %v1418_v2  ;;  %v1249_v43 = vld [vmem:[%s615_s24] ss:$0 sm:$0xff]  ;;  %s1682_s24 = sld [smem:[#allocation10_spill]] (!%p1256_p8) }
  0x26   : > { %1293 = vmatmul.mubr.msk.bf16.vlgmr.msra.gmra.mrb[0].mxu1 %vm661_vm2, %v637_v8  ;;  %v947_v48 = vld [vmem:[%s1564_s3] sm:$0xf] }
  0x27   : > { %1285 = vmatmul.mubr.msk.bf16.vlgmr.msra.gmra.mrb[0].mxu0 %vm661_vm2, %v636_v9  ;;  %1306 = vmatprep.mubr.msk.bf16.mxu1 %vm1419_vm1, %v1418_v2  ;;  %v952_v49 = vsel %vm901_vm4, %v947_v48, 0  ;;  %v945_v59 = vld [vmem:[#allocation2] sm:$0xff] }
  0x28   : > { %1300 = vmatprep.mubr.msk.bf16.mxu0 %vm1419_vm1, %v1418_v2  ;;  %1297 = vmatpush3.bf16.msra.mxu0 %v1369_v26 }
  0x29   : > { %1298 = vmatprep.subr.bf16.mxu0 %v1418_v2 }
  0x2c   : > { %1299 = vmatpush3.bf16.msra.mxu0 %v1370_v27 }
  0x2d   : > { %1310 = vmatprep.subr.bf16.mxu0 %v1418_v2 }
  0x2f   : > { %1301 = vmatmul.mubr.msk.bf16.vlgmr.msra.gmra.mrb[4].mxu0 %vm661_vm2, %v637_v8 }
  0x30   : > { %1312 = vmatprep.mubr.msk.bf16.mxu0 %vm1419_vm1, %v1418_v2 }
  0xf9   : > { %v765_v12 = vpop.f32.mrb[0].mxu1 }
  0xfa   : > { %v766_v13 = vadd.f32 %v1245_v10, %v765_v12  ;;  %v1294_v14 = vpop.f32.mrb[1].mxu1  ;;  %v699_v15 = vpop.f32.mrb[0].mxu0 }
  0xfb   : > { %v768_v16 = vpop.f32.mrb[2].mxu1  ;;  %v700_v17 = vadd.f32 %v1241_v11, %v699_v15  ;;  %v1286_v18 = vpop.f32.mrb[1].mxu0 }
  0xfc   : > { %v836_v19 = vpack.c.bf16 %v766_v13, %v766_v13  ;;  %v1295_v20 = vpop.f32.mrb[3].mxu1  ;;  %v702_v21 = vpop.f32.mrb[2].mxu0 }
  0xfd   : > { %v1287_v22 = vpop.f32.mrb[3].mxu0  ;;  %v834_v24 = vmul.f32 0.35355338, %v700_v17  ;;  %v1259_v17 = vld [vmem:[%s1684_s1] ss:$0 sm:$0xff] (!%p1256_p8) }
  0xfe   : > { %v843_v23 = vsel %vm838_vm3, %v836_v19, 0 }
  0xff   : > { %1305 = vmatpush3.bf16.xpose.msra.mxu1 %v843_v23  ;;  %v835_v25 = vpack.c.bf16 %v834_v24, %v834_v24 }
 0x100   : > { %1316 = vmatprep.subr.bf16.mxu1 %v1418_v2 }
 0x102   : > { %v828_v40 = vpop.f32.mrb[4].mxu0 }
 0x103   : > { %v1302_v41 = vpop.f32.mrb[5].mxu0  ;;  %v829_v45 = vadd.f32 %v1249_v43, %v828_v40 }
 0x104   : > { %v831_v42 = vpop.f32.mrb[6].mxu0 }
 0x105   : > { %v1303_v44 = vpop.f32.mrb[7].mxu0  ;;  %v897_v46 = vpack.c.bf16 %v829_v45, %v829_v45 }
 0x106   : > { %1307 = vmatmul.mubr.msk.bf16.vlgmr.msra.gmra.mrb[4].mxu1 %vm838_vm3, %v835_v25 }
 0x107   : > { %1318 = vmatprep.mubr.msk.bf16.mxu1 %vm1419_vm1, %v1418_v2  ;;  %v903_v47 = vsel %vm901_vm4, %v897_v46, 0  ;;  %1317 = vmatpush3.bf16.msra.mxu1 %v952_v49  ;;  %v1257_v2 = vld [vmem:[%s1682_s24] ss:$0 sm:$0xff] (!%p1256_p8) }
 0x108   : > { %1311 = vmatpush3.bf16.msra.mxu0 %v903_v47 }
 0x1d9   : > { %v879_v29 = vpop.f32.mrb[4].mxu1 }
 0x1da   : > { %v880_v30 = vadd.f32 %v879_v29, %v837_v28  ;;  %v1308_v31 = vpop.f32.mrb[5].mxu1 }
 0x1db   : > { %v882_v32 = vpop.f32.mrb[6].mxu1 }
 0x1dc   : > { %v1309_v33 = vpop.f32.mrb[7].mxu1  ;;  %v885_v34 = vsel %vm838_vm3, %v880_v30, -inf }
 0x1dd   : > { %886 = vmax.xlane.f32.xlu0 %v885_v34 }
 0x26a   : > { %v887_v35 = vpop.xlane.xlu0 %886 }
 0x26b   : > { %v888_v36 = vsub.f32 %v880_v30, %v887_v35 }
 0x26d   : > { %v889_v37 = vmul.f32 1.442695, %v888_v36 }
 0x26f   : > { %1371 = vpow2.f32 %v889_v37 }
 0x279   : > { %v1372_v38 = vpop.eup %1371 }
 0x27a   : > { %v891_v39 = vsel %vm838_vm3, %v1372_v38, 0.0 }
 0x27b   : > { %892 = vadd.xlane.f32.xlu0 %v891_v39 }
 0x308   : > { %v893_v50 = vpop.xlane.xlu0 %892 }
 0x309   : > { %1373 = vrcp.f32 %v893_v50 }
 0x313   : > { %v1374_v51 = vpop.eup %1373 }
 0x314   : > { %v895_v52 = vmul.f32 %v1374_v51, %v1372_v38 }
 0x316   : > { %v896_v53 = vpack.c.bf16 %v895_v52, %v895_v52 }
 0x318   : > { %1313 = vmatmul.mubr.msk.bf16.vlgmr.msra.gmra.mrb[8].mxu0 %vm838_vm3, %v896_v53 }
 0x3eb   : > { %v939_v54 = vpop.f32.mrb[8].mxu0 }
 0x3ec   : > { %v946_v55 = vpack.c.bf16 %v939_v54, %v939_v54  ;;  %v1314_v56 = vpop.f32.mrb[9].mxu0 }
 0x3ed   : > { %v942_v57 = vpop.f32.mrb[10].mxu0 }
 0x3ee   : > { %v1315_v58 = vpop.f32.mrb[11].mxu0  ;;  %1319 = vmatmul.mubr.msk.bf16.vlgmr.msra.gmra.mrb[8].mxu1 %vm838_vm3, %v946_v55 }
 0x4be   : > { %999 = sbr.rel (%p1256_p8) target bundleno = 1546 (0x60a), region = 80 }
 0x4c1   : > { %v988_v60 = vpop.f32.mrb[8].mxu1 }
 0x4c2   : > { %v994_v61 = vadd.f32 %v988_v60, %v945_v59  ;;  %v1320_v62 = vpop.f32.mrb[9].mxu1 }
 0x4c3   : > { %v991_v63 = vpop.f32.mrb[10].mxu1 }
 0x4c4   : > { %995 = vst.msk [vmem:[#allocation2] sm:$0xff] %vm661_vm2, %v994_v61  ;;  %v1321_v0 = vpop.f32.mrb[11].mxu1 }
 0x4cb   : > { %v1000_v1 = vld [vmem:[#allocation2] sm:$0xff] }
 0x4cc   : > { %v1008_v3 = vadd.f32 %v1257_v2, %v1000_v1 }
 0x4ce   : > { %v1009_v4 = vadd.f32 %v1008_v3, %v1578_v7  ;;  %v1258_v7 = vld [vmem:[%s1683_s28] ss:$0 sm:$0xff] }
 0x4d0   : > { %v1010_v5 = vsel %vm661_vm2, %v1009_v4, 0.0 }
 0x4d1   : > { %1011 = vadd.xlane.f32.xlu0 %v1010_v5 }
 0x55e   : > { %v1012_v6 = vpop.xlane.xlu0 %1011 }
 0x55f   : > { %v1014_v8 = vmul.f32 0.03125, %v1012_v6 }
 0x561   : > { %v1015_v9 = vsub.f32 %v1009_v4, %v1014_v8 }
 0x563   : > { %v1016_v10 = vmul.f32 %v1015_v9, %v1015_v9 }
 0x565   : > { %v1017_v11 = vsel %vm661_vm2, %v1016_v10, 0.0 }
 0x566   : > { %1018 = vadd.xlane.f32.xlu0 %v1017_v11 }
 0x5f3   : > { %v1019_v12 = vpop.xlane.xlu0 %1018 }
 0x5f4   : > { %v1020_v13 = vmul.f32 0.03125, %v1019_v12 }
 0x5f6   : > { %v1021_v14 = vadd.f32 1e-05, %v1020_v13 }
 0x5f8   : > { %1375 = vrsqrt.f32 %v1021_v14 }
 0x602   : > { %v1376_v15 = vpop.eup %1375 }
 0x603   : > { %v1023_v16 = vmul.f32 %v1376_v15, %v1015_v9 }
 0x605   : > { %v1031_v18 = vmul.f32 %v1258_v7, %v1023_v16 }
 0x607   : > { %v1039_v19 = vadd.f32 %v1259_v17, %v1031_v18 }
 0x609   : > { %1040 = vst.msk [vmem:[%s626_s11] sm:$0xff] %vm661_vm2, %v1039_v19 }
 0x60a PF: > { %s1685_s22 = sld [smem:[#allocation5_spill]]  ;;  %s1686_s25 = sld [smem:[#allocation3_spill]] }
 0x60b   : > { %s1687_s26 = sld [smem:[#allocation4_spill]]  ;;  %s1688_s27 = sld [smem:[#allocation6_spill]] }
 0x60c   : > { %s1689_s28 = sld [smem:[#allocation7_spill]] }
 0x610   : > { %s23_s29 = sadd.s32 1, %s1685_s22  }
 0x611   : > { %p20_p9 = scmp.ge.s32.totalorder %s23_s29, 10  }
 0x613   :  { %22 = sbr.rel (!%p20_p9) target bundleno = 6 (0x6), region = 137 }

// kernel: transformer_decoder.7
= control target key start
LH: loop header
LB: loop body
LE: loop exit
PB: predicated region body
PF: predicated region fallthrough
CT: control target
= control target key end

     0   :  { %s1423_s21 = smov 0   ;;  %s1425_s22 = smov 0   ;;  %s1581_s0 = inlined_call_operand.vmem [shape: f32[2,8,32], index: 0, kind: input, shape index: {}]   ;;  %s1582_s1 = inlined_call_operand.vmem [shape: f32[2,8,32], index: 1, kind: input, shape index: {}]   ;;  %s1583_s2 = inlined_call_operand.vmem [shape: bf16[4,32,8], index: 2, kind: input, shape index: {}]   ;;  %s1584_s3 = inlined_call_operand.vmem [shape: f32[4,1,8], index: 3, kind: input, shape index: {}]   ;;  %s1585_s4 = inlined_call_operand.vmem [shape: bf16[4,32,8], index: 4, kind: input, shape index: {}]   ;;  %s1586_s5 = inlined_call_operand.vmem [shape: f32[4,1,8], index: 5, kind: input, shape index: {}]   ;;  %s1587_s6 = inlined_call_operand.vmem [shape: bf16[4,32,8], index: 6, kind: input, shape index: {}]   ;;  %s1588_s7 = inlined_call_operand.vmem [shape: f32[4,1,8], index: 7, kind: input, shape index: {}]   ;;  %s1589_s8 = inlined_call_operand.vmem [shape: bf16[4,8,32], index: 8, kind: input, shape index: {}]   ;;  %s1590_s9 = inlined_call_operand.vmem [shape: f32[1,32], index: 9, kind: input, shape index: {}]   ;;  %s1591_s10 = inlined_call_operand.vmem [shape: f32[1,32], index: 10, kind: input, shape index: {}]   ;;  %s1592_s11 = inlined_call_operand.vmem [shape: f32[1,32], index: 11, kind: input, shape index: {}]   ;;  %s1593_s12 = inlined_call_operand.vmem [shape: f32[2,8,32], index: 12, kind: output, shape index: {}]  }
   0x1   :  { %1597 = sst [smem:[#allocation8_spill]] %s1582_s1  ;;  %s1427_s23 = smov 0  }
   0x2   :  { %1598 = sst [smem:[#allocation9_spill]] %s1583_s2  ;;  %s1429_s24 = smov 0  }
   0x3   :  { %1599 = sst [smem:[#allocation10_spill]] %s1591_s10  ;;  %s1431_s25 = smov 0  }
   0x4   :  { %1600 = sst [smem:[#allocation11_spill]] %s1592_s11 }
   0x5 LB: > { %1601 = sst [smem:[#allocation3_spill]] %s1345_s23  ;;  %s34_s26 = sadd.s32 1, %s1345_s23  ;;  %s1353_s25 = sphi %s1431_s25, %s22_s25   ;;  %s1349_s24 = sphi %s1429_s24, %s1616_s24   ;;  %s1345_s23 = sphi %s1427_s23, %s1615_s23   ;;  %s1341_s22 = sphi %s1425_s22, %s1614_s22   ;;  %s1337_s21 = sphi %s1423_s21, %s1613_s21  }
   0x6   : > { %1602 = sst [smem:[#allocation4_spill]] %s1349_s24  ;;  %s41_s27 = sadd.s32 1, %s1349_s24 }
   0x7   : > { %1603 = sst [smem:[#allocation5_spill]] %s1353_s25  ;;  %p35_p0 = scmp.ge.s32.totalorder %s34_s26, 4 }
   0x8   : > { %p1167_p1 = scmp.ge.s32.totalorder %s1353_s25, 1  ;;  %p459_p2 = scmp.lt.s32.totalorder %s1353_s25, 9 }
   0x9   : > { %s1618_s26 = smov (%p35_p0, %s34_s26), 0  ;;  %s1620_s27 = smov (!%p35_p0, %s41_s27), %s1349_s24 }
   0xa   : > { %1604 = sst [smem:[#allocation6_spill]] %s1618_s26  ;;  %p460_p3 = pnand %p1167_p1, %p459_p2 }
   0xb   : > { %p43_p4 = scmp.ge.s32.totalorder %s1620_s27, 2  ;;  %p537_p5 = scmp.lt.s32.totalorder (!%p460_p3), %s1341_s22, 1 }
   0xc   : > { %463 = sbr.rel (%p460_p3) target bundleno = 1543 (0x607), region = 68  ;;  %p548_p6 = scmp.lt.s32.totalorder (!%p460_p3), %s1337_s21, 3 }
   0xd   : > { %s1622_s27 = smov (%p43_p4, %s1620_s27), 0  ;;  %s1606_s1 = sld [smem:[#allocation8_spill]] (!%p460_p3) }
   0xe   : > { %1605 = sst [smem:[#allocation7_spill]] %s1622_s27  ;;  %s1607_s2 = sld [smem:[#allocation9_spill]] (!%p460_p3) }
   0xf   : > { %p1178_p7 = scmp.ne.s32.totalorder (!%p460_p3), %s1337_s21, 0 }
  0x13   : > { %s1624_s22 = smov (!%p537_p5, %s1341_s22), 1  ;;  %vm588_vm0 = vcmask (!%p1178_p7), 261120   ;;  %v1355_v0 = vmov (!%p1178_p7), 0.0  }
  0x14   : > { %s1457_s28 = scalar_select %p548_p6, %s1337_s21, 3 }
  0x15   : > { %s1459_s29 = sshll.u32 %s1624_s22, 3  ;;  %587 = sbr.rel (%p1178_p7) target bundleno = 28 (0x1c), region = 72  ;;  %589 = vst.msk [vmem:[#allocation2] sm:$0xff] (!%p1178_p7), %vm588_vm0, %v1355_v0 }
  0x16   : > { %s547_s17 = scalar_lea.vmem %s1606_s1, %s1459_s29  ;;  %s1200_s18 = sshll.u32 %s1457_s28, 4 }
  0x17   : > { %s552_s22 = scalar_lea.vmem %s1607_s2, %s1200_s18  ;;  %s560_s30 = scalar_lea.vmem %s1585_s4, %s1200_s18 }
  0x18   : > { %s563_s14 = scalar_lea.vmem %s1586_s5, %s1457_s28  ;;  %s1487_s16 = scalar_lea.vmem %s1587_s6, %s1200_s18 }
  0x19   : > { %s571_s20 = scalar_lea.vmem %s1588_s7, %s1457_s28  ;;  %s1176_s27 = sshll.u32 %s1457_s28, 2 }
  0x1a   : > { %s1497_s2 = scalar_lea.vmem %s1589_s8, %s1176_s27  ;;  %s582_s11 = scalar_lea.vmem %s1593_s12, %s1459_s29 }
  0x1c PF: > { %v1303_v1 = vld [vmem:[%s560_s30] sm:$0xff]   ;;  %v1356_v2 = vmov 0.0   ;;  %v1305_v4 = vld [vmem:[%s560_s30 + $0x8] sm:$0xff]   ;;  %vm1357_vm1 = vmmov 0   ;;  %s1608_s27 = scalar_lea.vmem %s1581_s0, %s1459_s29  ;;  %vm617_vm2 = vcmask 261120   ;;  %s1609_s13 = scalar_lea.vmem %s1584_s3, %s1457_s28  ;;  %vm793_vm3 = vcmask 64512  }
  0x1d   : > { %1226 = vmatprep.subr.bf16.mxu1 %v1356_v2  ;;  %1218 = vmatprep.subr.bf16.mxu0 %v1356_v2  ;;  %v1304_v3 = vld [vmem:[%s552_s22] sm:$0xff]   ;;  %v1306_v6 = vld [vmem:[%s552_s22 + $0x8] sm:$0xff]   ;;  %vm856_vm4 = vcmask 1043456   ;;  %p1194_p8 = scmp.ne.s32.totalorder %s1337_s21, 3 }
  0x1e   : > { %1227 = vmatpush3.bf16.msra.mxu1 %v1303_v1  ;;  %1230 = vmatprep.mubr.msk.bf16.mxu1 %vm1357_vm1, %v1356_v2  ;;  %v591_v5 = vld [vmem:[%s547_s17] sm:$0xff]  ;;  %v1308_v27 = vld [vmem:[%s1487_s16 + $0x8] sm:$0xff]   ;;  %s1610_s19 = sld [smem:[#allocation10_spill]] (!%p1194_p8)  ;;  %s1611_s26 = sld [smem:[#allocation11_spill]] (!%p1194_p8) }
  0x1f   : > { %1228 = vmatprep.subr.bf16.mxu1 %v1356_v2  ;;  %1219 = vmatpush3.bf16.msra.mxu0 %v1304_v3  ;;  %v1511_v7 = vld [vmem:[%s1608_s27] sm:$0xff]  ;;  %v593_v8 = vpack.c.bf16 %v591_v5, %v591_v5 }
  0x20   : > { %1220 = vmatprep.subr.bf16.mxu0 %v1356_v2  ;;  %1222 = vmatprep.mubr.msk.bf16.mxu0 %vm1357_vm1, %v1356_v2  ;;  %v592_v9 = vpack.c.bf16 %v1511_v7, %v1511_v7  ;;  %v1183_v10 = vld [vmem:[%s563_s14] ss:$0 sm:$0xff] }
  0x21   : > { %v1179_v11 = vld [vmem:[%s1609_s13] ss:$0 sm:$0xff] }
  0x22   : > { %1229 = vmatpush3.bf16.msra.mxu1 %v1305_v4  ;;  %v1307_v26 = vld [vmem:[%s1487_s16] sm:$0xff]  }
  0x23   : > { %1221 = vmatpush3.bf16.msra.mxu0 %v1306_v6  ;;  %1242 = vmatprep.subr.bf16.mxu1 %v1356_v2  ;;  %v1187_v41 = vld [vmem:[%s571_s20] ss:$0 sm:$0xff] }
  0x24   : > { %1234 = vmatprep.subr.bf16.mxu0 %v1356_v2  ;;  %v902_v46 = vld [vmem:[%s1497_s2] sm:$0xf] }
  0x25   : > { %1231 = vmatmul.mubr.msk.bf16.vlgmr.msra.gmra.mrb[0].mxu1 %vm617_vm2, %v593_v8  ;;  %v907_v47 = vsel %vm856_vm4, %v902_v46, 0  ;;  %v900_v57 = vld [vmem:[#allocation2] sm:$0xff] }
  0x26   : > { %1223 = vmatmul.mubr.msk.bf16.vlgmr.msra.gmra.mrb[0].mxu0 %vm617_vm2, %v592_v9  ;;  %1244 = vmatprep.mubr.msk.bf16.mxu1 %vm1357_vm1, %v1356_v2  ;;  %v1195_v0 = vld [vmem:[%s1590_s9] ss:$0 sm:$0xff] (!%p1194_p8) }
  0x27   : > { %1238 = vmatprep.mubr.msk.bf16.mxu0 %vm1357_vm1, %v1356_v2  ;;  %1235 = vmatpush3.bf16.msra.mxu0 %v1307_v26 }
  0x28   : > { %1236 = vmatprep.subr.bf16.mxu0 %v1356_v2 }
  0x2b   : > { %1237 = vmatpush3.bf16.msra.mxu0 %v1308_v27 }
  0x2c   : > { %1248 = vmatprep.subr.bf16.mxu0 %v1356_v2 }
  0x2e   : > { %1239 = vmatmul.mubr.msk.bf16.vlgmr.msra.gmra.mrb[4].mxu0 %vm617_vm2, %v593_v8 }
  0x2f   : > { %1250 = vmatprep.mubr.msk.bf16.mxu0 %vm1357_vm1, %v1356_v2 }
  0xf8   : > { %v721_v12 = vpop.f32.mrb[0].mxu1 }
  0xf9   : > { %v722_v13 = vadd.f32 %v1183_v10, %v721_v12  ;;  %v1232_v14 = vpop.f32.mrb[1].mxu1  ;;  %v655_v15 = vpop.f32.mrb[0].mxu0 }
  0xfa   : > { %v724_v16 = vpop.f32.mrb[2].mxu1  ;;  %v656_v17 = vadd.f32 %v1179_v11, %v655_v15  ;;  %v1224_v18 = vpop.f32.mrb[1].mxu0  ;;  %v1197_v15 = vld [vmem:[%s1611_s26] ss:$0 sm:$0xff] (!%p1194_p8) }
  0xfb   : > { %v792_v19 = vpack.c.bf16 %v722_v13, %v722_v13  ;;  %v1233_v20 = vpop.f32.mrb[3].mxu1  ;;  %v658_v21 = vpop.f32.mrb[2].mxu0 }
  0xfc   : > { %v1225_v22 = vpop.f32.mrb[3].mxu0  ;;  %v790_v24 = vmul.f32 0.35355338, %v656_v17 }
  0xfd   : > { %v798_v23 = vsel %vm793_vm3, %v792_v19, 0 }
  0xfe   : > { %1243 = vmatpush3.bf16.xpose.msra.mxu1 %v798_v23  ;;  %v791_v25 = vpack.c.bf16 %v790_v24, %v790_v24 }
  0xff   : > { %1254 = vmatprep.subr.bf16.mxu1 %v1356_v2 }
 0x101   : > { %v784_v38 = vpop.f32.mrb[4].mxu0 }
 0x102   : > { %v1240_v39 = vpop.f32.mrb[5].mxu0  ;;  %v785_v43 = vadd.f32 %v1187_v41, %v784_v38 }
 0x103   : > { %v787_v40 = vpop.f32.mrb[6].mxu0 }
 0x104   : > { %v1241_v42 = vpop.f32.mrb[7].mxu0  ;;  %v852_v44 = vpack.c.bf16 %v785_v43, %v785_v43 }
 0x105   : > { %1245 = vmatmul.mubr.msk.bf16.vlgmr.msra.gmra.mrb[4].mxu1 %vm793_vm3, %v791_v25 }
 0x106   : > { %1256 = vmatprep.mubr.msk.bf16.mxu1 %vm1357_vm1, %v1356_v2  ;;  %v858_v45 = vsel %vm856_vm4, %v852_v44, 0  ;;  %1255 = vmatpush3.bf16.msra.mxu1 %v907_v47 }
 0x107   : > { %1249 = vmatpush3.bf16.msra.mxu0 %v858_v45 }
 0x1d8   : > { %v834_v28 = vpop.f32.mrb[4].mxu1 }
 0x1d9   : > { %v1246_v29 = vpop.f32.mrb[5].mxu1  ;;  %v840_v30 = vsel %vm793_vm3, %v834_v28, -inf }
 0x1da   : > { %841 = vmax.xlane.f32.xlu0 %v840_v30  ;;  %v837_v31 = vpop.f32.mrb[6].mxu1 }
 0x1db   : > { %v1247_v32 = vpop.f32.mrb[7].mxu1 }
 0x267   : > { %v842_v33 = vpop.xlane.xlu0 %841 }
 0x268   : > { %v843_v34 = vsub.f32 %v834_v28, %v842_v33 }
 0x26a   : > { %v844_v35 = vmul.f32 1.442695, %v843_v34 }
 0x26c   : > { %1309 = vpow2.f32 %v844_v35 }
 0x276   : > { %v1310_v36 = vpop.eup %1309 }
 0x277   : > { %v846_v37 = vsel %vm793_vm3, %v1310_v36, 0.0 }
 0x278   : > { %847 = vadd.xlane.f32.xlu0 %v846_v37 }
 0x305   : > { %v848_v48 = vpop.xlane.xlu0 %847 }
 0x306   : > { %1311 = vrcp.f32 %v848_v48 }
 0x310   : > { %v1312_v49 = vpop.eup %1311 }
 0x311   : > { %v850_v50 = vmul.f32 %v1312_v49, %v1310_v36 }
 0x313   : > { %v851_v51 = vpack.c.bf16 %v850_v50, %v850_v50 }
 0x315   : > { %1251 = vmatmul.mubr.msk.bf16.vlgmr.msra.gmra.mrb[8].mxu0 %vm793_vm3, %v851_v51 }
 0x3e8   : > { %v894_v52 = vpop.f32.mrb[8].mxu0 }
 0x3e9   : > { %v901_v53 = vpack.c.bf16 %v894_v52, %v894_v52  ;;  %v1252_v54 = vpop.f32.mrb[9].mxu0 }
 0x3ea   : > { %v897_v55 = vpop.f32.mrb[10].mxu0 }
 0x3eb   : > { %v1253_v56 = vpop.f32.mrb[11].mxu0  ;;  %1257 = vmatmul.mubr.msk.bf16.vlgmr.msra.gmra.mrb[8].mxu1 %vm793_vm3, %v901_v53 }
 0x4bb   : > { %954 = sbr.rel (%p1194_p8) target bundleno = 1543 (0x607), region = 76 }
 0x4be   : > { %v943_v58 = vpop.f32.mrb[8].mxu1 }
 0x4bf   : > { %v949_v59 = vadd.f32 %v943_v58, %v900_v57  ;;  %v1258_v60 = vpop.f32.mrb[9].mxu1 }
 0x4c0   : > { %v946_v61 = vpop.f32.mrb[10].mxu1 }
 0x4c1   : > { %950 = vst.msk [vmem:[#allocation2] sm:$0xff] %vm617_vm2, %v949_v59  ;;  %v1259_v62 = vpop.f32.mrb[11].mxu1 }
 0x4c8   : > { %v955_v63 = vld [vmem:[#allocation2] sm:$0xff] }
 0x4c9   : > { %v963_v1 = vadd.f32 %v1195_v0, %v955_v63 }
 0x4cb   : > { %v964_v2 = vadd.f32 %v963_v1, %v1511_v7  ;;  %v1196_v7 = vld [vmem:[%s1610_s19] ss:$0 sm:$0xff] }
 0x4cd   : > { %v965_v3 = vsel %vm617_vm2, %v964_v2, 0.0 }
 0x4ce   : > { %966 = vadd.xlane.f32.xlu0 %v965_v3 }
 0x55b   : > { %v967_v4 = vpop.xlane.xlu0 %966 }
 0x55c   : > { %v969_v5 = vmul.f32 0.03125, %v967_v4 }
 0x55e   : > { %v970_v6 = vsub.f32 %v964_v2, %v969_v5 }
 0x560   : > { %v971_v8 = vmul.f32 %v970_v6, %v970_v6 }
 0x562   : > { %v972_v9 = vsel %vm617_vm2, %v971_v8, 0.0 }
 0x563   : > { %973 = vadd.xlane.f32.xlu0 %v972_v9 }
 0x5f0   : > { %v974_v10 = vpop.xlane.xlu0 %973 }
 0x5f1   : > { %v975_v11 = vmul.f32 0.03125, %v974_v10 }
 0x5f3   : > { %v976_v12 = vadd.f32 1e-05, %v975_v11 }
 0x5f5   : > { %1313 = vrsqrt.f32 %v976_v12 }
 0x5ff   : > { %v1314_v13 = vpop.eup %1313 }
 0x600   : > { %v978_v14 = vmul.f32 %v1314_v13, %v970_v6 }
 0x602   : > { %v986_v16 = vmul.f32 %v1196_v7, %v978_v14 }
 0x604   : > { %v994_v17 = vadd.f32 %v1197_v15, %v986_v16 }
 0x606   : > { %995 = vst.msk [vmem:[%s582_s11] sm:$0xff] %vm617_vm2, %v994_v17 }
 0x607 PF: > { %s1612_s1 = sld [smem:[#allocation5_spill]]  ;;  %s1613_s21 = sld [smem:[#allocation3_spill]] }
 0x608   : > { %s1614_s22 = sld [smem:[#allocation4_spill]]  ;;  %s1615_s23 = sld [smem:[#allocation6_spill]] }
 0x609   : > { %s1616_s24 = sld [smem:[#allocation7_spill]] }
 0x60d   : > { %s22_s25 = sadd.s32 1, %s1612_s1  }
 0x60e   : > { %p19_p9 = scmp.ge.s32.totalorder %s22_s25, 10  }
 0x610   :  { %21 = sbr.rel (!%p19_p9) target bundleno = 5 (0x5), region = 130 }

</bundles_post_ra>
